<compile_context>
chip_gen: v7x
topology: tpu7x:2x2x1
jax: 0.10.0
libtpu: 0.0.40
codegen_flags: <defaults>
</compile_context>

<pallas_src>
import jax
import jax.numpy as jnp
from jax import lax
from jax.experimental import pallas as pl
from jax.experimental.pallas import tpu as pltpu


def _vlfusion_kernel(fv_ref, fl_ref, wv_ref, bv_ref, wl_ref, bl_ref, pr_ref,
                     out_ref):
    # fv_ref : (B_TILE, 256, HW)   f32   -- channel-major (PyTorch-native) vision tokens
    # fl_ref : (B_TILE, S, 768)    f32   -- language tokens
    # wv_ref : (256, 256)          bf16  -- v_proj weight, [out, in]
    # wl_ref : (256, 768)          bf16  -- l_proj weight, [out, in]
    # bv/bl/pr : (256, 1)          f32   -- broadcast along the lane (token) axis
    # out_ref: (B_TILE, 256, HW + S + 1)  bf16 -- x0 in PyTorch layout [256, N]
    b_tile, _, hw = fv_ref.shape
    seq = fl_ref.shape[1]
    cd = wv_ref.dtype  # bf16 compute dtype for MXU inputs

    # l_proj, all B_TILE batches folded into one matmul:
    #   (256_out, 768) . (B_TILE*seq, 768)^T -> (256, B_TILE*seq), f32 accumulation.
    fl_flat = fl_ref[...].reshape(b_tile * seq, 768).astype(cd)
    pl_all = lax.dot_general(
        wl_ref[...], fl_flat,
        dimension_numbers=(((1,), (1,)), ((), ())),
        preferred_element_type=jnp.float32)
    pl_all = jnp.maximum(pl_all + bl_ref[...], 0.0)        # f32 epilogue (v5e-safe)

    pr_val = pr_ref[...].astype(out_ref.dtype)              # (256, 1)

    for b in range(b_tile):  # static unroll over the batch tile
        # v_proj: (256_out, 256_in) . (256_in, hw) -> (256, hw), f32 accumulation.
        pv = lax.dot_general(
            wv_ref[...], fv_ref[b].astype(cd),
            dimension_numbers=(((1,), (0,)), ((), ())),
            preferred_element_type=jnp.float32)
        pv = jnp.maximum(pv + bv_ref[...], 0.0)
        out_ref[b, :, 0:hw] = pv.astype(out_ref.dtype)
        out_ref[b, :, hw:hw + seq] = (
            pl_all[:, b * seq:(b + 1) * seq].astype(out_ref.dtype))
        # Learned [pr] token appended as the last column.
        out_ref[b, :, hw + seq:hw + seq + 1] = pr_val


def _pick_b_tile(bs, max_tile=8):
    """Largest divisor of bs <= max_tile, capped so the grid has >= 2 steps
    whenever bs >= 2 (keeps both v7x TensorCores busy via the 'parallel' axis)."""
    cap = min(max_tile, bs if bs < 2 else max(1, bs // 2))
    for t in range(cap, 0, -1):
        if bs % t == 0:
            return t
    return 1


def vlfusion_forward(fv, fl, params):
    """fv: [bs, 256, h, w] (NCHW) f32, fl: [bs, seq, 768] f32.
    Returns x0: [bs, 256, hw+seq+1] in bf16 (downstream transformer dtype)."""
    bs, c, h, w = fv.shape
    _, seq, l = fl.shape
    assert c == 256 and l == 768
    hw = h * w
    n_tok = hw + seq + 1
    out_dtype = jnp.bfloat16

    # Channel-major: flatten spatial dims only (metadata reshape, no HBM transpose),
    # NO dtype conversion here -- the kernel casts to bf16 in VMEM.
    fv_flat = fv.reshape(bs, c, hw)
    wv, wl = params["wv"], params["wl"]                 # bf16, [out, in], pre-cast at init
    bv, bl, pr = params["bv"], params["bl"], params["pr"]   # (256, 1) f32

    b_tile = _pick_b_tile(bs)
    grid = (bs // b_tile,)

    flops = 2 * bs * (256 * 256 * hw + 256 * 768 * seq)
    bytes_accessed = (fv_flat.size * 4 + fl.size * 4            # f32 activations in
                      + wv.size * 2 + wl.size * 2               # bf16 weights (once)
                      + (bv.size + bl.size + pr.size) * 4       # f32 biases / pr
                      + bs * 256 * n_tok * 2)                   # bf16 x0 out

    out = pl.pallas_call(
        _vlfusion_kernel,
        out_shape=jax.ShapeDtypeStruct((bs, 256, n_tok), out_dtype),
        grid_spec=pl.GridSpec(
            grid=grid,
            in_specs=[
                pl.BlockSpec((b_tile, 256, hw), lambda g: (g, 0, 0)),   # fv (channel-major)
                pl.BlockSpec((b_tile, seq, 768), lambda g: (g, 0, 0)),  # fl
                pl.BlockSpec((256, 256), lambda g: (0, 0)),             # Wv (constant)
                pl.BlockSpec((256, 1), lambda g: (0, 0)),               # bv (constant)
                pl.BlockSpec((256, 768), lambda g: (0, 0)),             # Wl (constant)
                pl.BlockSpec((256, 1), lambda g: (0, 0)),               # bl (constant)
                pl.BlockSpec((256, 1), lambda g: (0, 0)),               # pr (constant)
            ],
            out_specs=pl.BlockSpec((b_tile, 256, n_tok), lambda g: (g, 0, 0)),
        ),
        compiler_params=pltpu.CompilerParams(
            dimension_semantics=("parallel",)),
        cost_estimate=pl.CostEstimate(
            flops=flops, transcendentals=0, bytes_accessed=bytes_accessed),
    )(fv_flat, fl, wv, bv, wl, bl, pr)

    # `out` is already in PyTorch's x0 layout [bs, 256, N] -- no exit transpose.
    # (The PyTorch module also builds `mask = zeros([bs, 441]).bool()` for the
    #  downstream transformer; omitted here since this script stops at x0.)
    return out


def _reference(fv, fl, params):
    """Pure-JAX reference with the same bf16-in / f32-accumulate / bf16-out numerics."""
    bs, c, h, w = fv.shape
    cd = jnp.bfloat16
    fv_tok = jnp.transpose(fv.reshape(bs, c, h * w), (0, 2, 1)).astype(cd)
    wv = params["wv"].astype(cd)
    wl = params["wl"].astype(cd)
    pv = jnp.maximum(
        jnp.einsum("bnc,dc->bnd", fv_tok, wv, preferred_element_type=jnp.float32)
        + params["bv"][:, 0], 0.0)
    pl_ = jnp.maximum(
        jnp.einsum("bnc,dc->bnd", fl.astype(cd), wl, preferred_element_type=jnp.float32)
        + params["bl"][:, 0], 0.0)
    pv = jnp.transpose(pv, (0, 2, 1))            # [bs, 256, hw]
    pl_ = jnp.transpose(pl_, (0, 2, 1))          # [bs, 256, seq]
    pr = jnp.broadcast_to(params["pr"][None], (bs, 256, 1))
    return jnp.concatenate([pv, pl_, pr], axis=2).astype(jnp.bfloat16)


def init_params(key):
    """Weights are stored in bf16 once here (compute dtype), so the per-call path
    has no constant-reconversion HBM pass.  Biases / pr stay f32 for the epilogue."""
    k1, k2, k3, k4, k5 = jax.random.split(key, 5)
    return {
        # PyTorch-native Linear weight layout: [out, in]
        "wv": (0.02 * jax.random.normal(k1, (256, 256), jnp.float32)).astype(jnp.bfloat16),
        "bv": 0.01 * jax.random.normal(k2, (256, 1), jnp.float32),
        "wl": (0.02 * jax.random.normal(k3, (256, 768), jnp.float32)).astype(jnp.bfloat16),
        "bl": 0.01 * jax.random.normal(k4, (256, 1), jnp.float32),
        "pr": 0.02 * jax.random.normal(k5, (256, 1), jnp.float32),  # Embedding(1, 256)
    }


if __name__ == "__main__":
    key = jax.random.PRNGKey(0)
    kp, kv, kl = jax.random.split(key, 3)

    bs, c, h, w = 2, 256, 4, 4   # c fixed at 256 by Linear(256, 256)
    seq, l = 8, 768              # l fixed at 768 by Linear(768, 256)

    params = init_params(kp)
    fv = jax.random.normal(kv, (bs, c, h, w), jnp.float32)
    fl = jax.random.normal(kl, (bs, seq, l), jnp.float32)

    x0 = jax.block_until_ready(vlfusion_forward(fv, fl, params))
    ref = _reference(fv, fl, params)

    assert x0.shape == (bs, 256, h * w + seq + 1)
    assert x0.dtype == jnp.bfloat16
    diff = jnp.max(jnp.abs(x0.astype(jnp.float32) - ref.astype(jnp.float32)))
    assert jnp.allclose(x0.astype(jnp.float32), ref.astype(jnp.float32),
                        atol=2e-2, rtol=2e-2), float(diff)

    print("KERNEL_OK")
</pallas_src>

<mosaic_0001>
module attributes {stable_mosaic.version = 11 : i64} {
  func.func @_vlfusion_kernel(%arg0: i32, %arg1: memref<1x256x16xf32, #tpu.memory_space<vmem>>, %arg2: memref<1x8x768xf32, #tpu.memory_space<vmem>>, %arg3: memref<256x256xbf16, #tpu.memory_space<vmem>>, %arg4: memref<256x1xf32, #tpu.memory_space<vmem>>, %arg5: memref<256x768xbf16, #tpu.memory_space<vmem>>, %arg6: memref<256x1xf32, #tpu.memory_space<vmem>>, %arg7: memref<256x1xf32, #tpu.memory_space<vmem>>, %arg8: memref<1x256x25xbf16, #tpu.memory_space<vmem>>) attributes {dimension_semantics = [#tpu.dimension_semantics<parallel>], iteration_bounds = array<i64: 2>, scalar_prefetch = 0 : i64, scratch_operands = 0 : i64, tpu.core_type = #tpu.core_type<tc>, window_params = [{transform_indices = @transform_0, window_bounds = array<i64: 1, 256, 16>}, {transform_indices = @transform_1, window_bounds = array<i64: 1, 8, 768>}, {pipeline_mode = #tpu.pipeline_mode<synchronous>, transform_indices = @transform_2, window_bounds = array<i64: 256, 256>}, {pipeline_mode = #tpu.pipeline_mode<synchronous>, transform_indices = @transform_3, window_bounds = array<i64: 256, 1>}, {pipeline_mode = #tpu.pipeline_mode<synchronous>, transform_indices = @transform_4, window_bounds = array<i64: 256, 768>}, {pipeline_mode = #tpu.pipeline_mode<synchronous>, transform_indices = @transform_5, window_bounds = array<i64: 256, 1>}, {pipeline_mode = #tpu.pipeline_mode<synchronous>, transform_indices = @transform_6, window_bounds = array<i64: 256, 1>}, {transform_indices = @transform_7, window_bounds = array<i64: 1, 256, 25>}]} {
    %c0 = arith.constant 0 : index
    %c0_0 = arith.constant 0 : index
    %c0_1 = arith.constant 0 : index
    %0 = vector.load %arg2[%c0, %c0_0, %c0_1] : memref<1x8x768xf32, #tpu.memory_space<vmem>>, vector<1x8x768xf32>
    %1 = vector.shape_cast %0 : vector<1x8x768xf32> to vector<8x768xf32>
    %2 = arith.truncf %1 : vector<8x768xf32> to vector<8x768xbf16>
    %c0_2 = arith.constant 0 : index
    %c0_3 = arith.constant 0 : index
    %3 = vector.load %arg5[%c0_2, %c0_3] : memref<256x768xbf16, #tpu.memory_space<vmem>>, vector<256x768xbf16>
    %cst = arith.constant dense<0.000000e+00> : vector<256x8xf32>
    %4 = tpu.matmul %3, %2, %cst {dimension_numbers = #tpu.dot_dimension_numbers<[1], [1], [0], [0], [0, 0, 1, 0], [], []>} : vector<256x768xbf16>, vector<8x768xbf16>, vector<256x8xf32> -> vector<256x8xf32>
    %c0_4 = arith.constant 0 : index
    %c0_5 = arith.constant 0 : index
    %5 = vector.load %arg6[%c0_4, %c0_5] : memref<256x1xf32, #tpu.memory_space<vmem>>, vector<256x1xf32>
    %6 = vector.broadcast %5 : vector<256x1xf32> to vector<256x8xf32>
    %7 = arith.addf %4, %6 : vector<256x8xf32>
    %cst_6 = arith.constant 0.000000e+00 : f32
    %8 = vector.broadcast %cst_6 : f32 to vector<256x8xf32>
    %9 = arith.maximumf %7, %8 : vector<256x8xf32>
    %c0_7 = arith.constant 0 : index
    %c0_8 = arith.constant 0 : index
    %10 = vector.load %arg7[%c0_7, %c0_8] : memref<256x1xf32, #tpu.memory_space<vmem>>, vector<256x1xf32>
    %11 = arith.truncf %10 : vector<256x1xf32> to vector<256x1xbf16>
    %c0_9 = arith.constant 0 : index
    %c0_10 = arith.constant 0 : index
    %12 = vector.load %arg3[%c0_9, %c0_10] : memref<256x256xbf16, #tpu.memory_space<vmem>>, vector<256x256xbf16>
    %c0_11 = arith.constant 0 : index
    %c0_12 = arith.constant 0 : index
    %c0_13 = arith.constant 0 : index
    %13 = vector.load %arg1[%c0_11, %c0_12, %c0_13] : memref<1x256x16xf32, #tpu.memory_space<vmem>>, vector<1x256x16xf32>
    %14 = vector.shape_cast %13 : vector<1x256x16xf32> to vector<256x16xf32>
    %15 = arith.truncf %14 : vector<256x16xf32> to vector<256x16xbf16>
    %cst_14 = arith.constant dense<0.000000e+00> : vector<256x16xf32>
    %16 = tpu.matmul %12, %15, %cst_14 {dimension_numbers = #tpu.dot_dimension_numbers<[1], [0], [0], [1], [0, 0, 1, 1], [], []>} : vector<256x256xbf16>, vector<256x16xbf16>, vector<256x16xf32> -> vector<256x16xf32>
    %c0_15 = arith.constant 0 : index
    %c0_16 = arith.constant 0 : index
    %17 = vector.load %arg4[%c0_15, %c0_16] : memref<256x1xf32, #tpu.memory_space<vmem>>, vector<256x1xf32>
    %18 = vector.broadcast %17 : vector<256x1xf32> to vector<256x16xf32>
    %19 = arith.addf %16, %18 : vector<256x16xf32>
    %cst_17 = arith.constant 0.000000e+00 : f32
    %20 = vector.broadcast %cst_17 : f32 to vector<256x16xf32>
    %21 = arith.maximumf %19, %20 : vector<256x16xf32>
    %22 = arith.truncf %21 : vector<256x16xf32> to vector<256x16xbf16>
    %c0_18 = arith.constant 0 : index
    %c0_19 = arith.constant 0 : index
    %c0_20 = arith.constant 0 : index
    %23 = vector.load %arg8[%c0_18, %c0_19, %c0_20] : memref<1x256x25xbf16, #tpu.memory_space<vmem>>, vector<1x256x16xbf16>
    %24 = vector.shape_cast %23 : vector<1x256x16xbf16> to vector<256x16xbf16>
    %25 = vector.shape_cast %22 : vector<256x16xbf16> to vector<1x256x16xbf16>
    tpu.vector_store %arg8[%c0_18, %c0_19, %c0_20], %25 {strides = array<i32>} : memref<1x256x25xbf16, #tpu.memory_space<vmem>>, vector<1x256x16xbf16>,
    %26 = arith.truncf %9 : vector<256x8xf32> to vector<256x8xbf16>
    %c0_21 = arith.constant 0 : index
    %c0_22 = arith.constant 0 : index
    %c16 = arith.constant 16 : index
    %27 = vector.load %arg8[%c0_21, %c0_22, %c16] : memref<1x256x25xbf16, #tpu.memory_space<vmem>>, vector<1x256x8xbf16>
    %28 = vector.shape_cast %27 : vector<1x256x8xbf16> to vector<256x8xbf16>
    %29 = vector.shape_cast %26 : vector<256x8xbf16> to vector<1x256x8xbf16>
    tpu.vector_store %arg8[%c0_21, %c0_22, %c16], %29 {strides = array<i32>} : memref<1x256x25xbf16, #tpu.memory_space<vmem>>, vector<1x256x8xbf16>,
    %c0_23 = arith.constant 0 : index
    %c0_24 = arith.constant 0 : index
    %c24 = arith.constant 24 : index
    %30 = vector.load %arg8[%c0_23, %c0_24, %c24] : memref<1x256x25xbf16, #tpu.memory_space<vmem>>, vector<1x256x1xbf16>
    %31 = vector.shape_cast %30 : vector<1x256x1xbf16> to vector<256x1xbf16>
    %32 = vector.shape_cast %11 : vector<256x1xbf16> to vector<1x256x1xbf16>
    tpu.vector_store %arg8[%c0_23, %c0_24, %c24], %32 {strides = array<i32>} : memref<1x256x25xbf16, #tpu.memory_space<vmem>>, vector<1x256x1xbf16>,
    return
  }
  func.func @transform_0(%arg0: i32) -> (i32, i32, i32) {
    %c0_i32 = arith.constant 0 : i32
    %c0_i32_0 = arith.constant 0 : i32
    %c0_i32_1 = arith.constant 0 : i32
    return %arg0, %c0_i32, %c0_i32_0 : i32, i32, i32
  }
  func.func @transform_1(%arg0: i32) -> (i32, i32, i32) {
    %c0_i32 = arith.constant 0 : i32
    %c0_i32_0 = arith.constant 0 : i32
    %c0_i32_1 = arith.constant 0 : i32
    return %arg0, %c0_i32, %c0_i32_0 : i32, i32, i32
  }
  func.func @transform_2(%arg0: i32) -> (i32, i32) {
    %c0_i32 = arith.constant 0 : i32
    %c0_i32_0 = arith.constant 0 : i32
    %c0_i32_1 = arith.constant 0 : i32
    return %c0_i32, %c0_i32_0 : i32, i32
  }
  func.func @transform_3(%arg0: i32) -> (i32, i32) {
    %c0_i32 = arith.constant 0 : i32
    %c0_i32_0 = arith.constant 0 : i32
    %c0_i32_1 = arith.constant 0 : i32
    return %c0_i32, %c0_i32_0 : i32, i32
  }
  func.func @transform_4(%arg0: i32) -> (i32, i32) {
    %c0_i32 = arith.constant 0 : i32
    %c0_i32_0 = arith.constant 0 : i32
    %c0_i32_1 = arith.constant 0 : i32
    return %c0_i32, %c0_i32_0 : i32, i32
  }
  func.func @transform_5(%arg0: i32) -> (i32, i32) {
    %c0_i32 = arith.constant 0 : i32
    %c0_i32_0 = arith.constant 0 : i32
    %c0_i32_1 = arith.constant 0 : i32
    return %c0_i32, %c0_i32_0 : i32, i32
  }
  func.func @transform_6(%arg0: i32) -> (i32, i32) {
    %c0_i32 = arith.constant 0 : i32
    %c0_i32_0 = arith.constant 0 : i32
    %c0_i32_1 = arith.constant 0 : i32
    return %c0_i32, %c0_i32_0 : i32, i32
  }
  func.func @transform_7(%arg0: i32) -> (i32, i32, i32) {
    %c0_i32 = arith.constant 0 : i32
    %c0_i32_0 = arith.constant 0 : i32
    %c0_i32_1 = arith.constant 0 : i32
    return %arg0, %c0_i32, %c0_i32_0 : i32, i32, i32
  }
}

</mosaic_0001>

<bundles_post_ra>
// kernel: tpu_custom_call.1
= control target key start
LH: loop header
LB: loop body
LE: loop exit
PB: predicated region body
PF: predicated region fallthrough
CT: control target
= control target key end

     0   :  { %s3761_s24 = smov 0   ;;  %s5128_s0 = inlined_call_operand.vmem [shape: f32[2,256,16], index: 0, kind: input, shape index: {}]   ;;  %s5129_s1 = inlined_call_operand.vmem [shape: f32[2,8,768], index: 1, kind: input, shape index: {}]   ;;  %s5130_s2 = inlined_call_operand.vmem [shape: bf16[256,256], index: 2, kind: input, shape index: {}]   ;;  %s5131_s3 = inlined_call_operand.vmem [shape: f32[256,1], index: 3, kind: input, shape index: {}]   ;;  %s5132_s4 = inlined_call_operand.vmem [shape: bf16[256,768], index: 4, kind: input, shape index: {}]   ;;  %s5133_s5 = inlined_call_operand.vmem [shape: f32[256,1], index: 5, kind: input, shape index: {}]   ;;  %s5134_s6 = inlined_call_operand.vmem [shape: f32[256,1], index: 6, kind: input, shape index: {}]   ;;  %s5135_s7 = inlined_call_operand.vmem [shape: bf16[2,256,25], index: 7, kind: output, shape index: {}]  }
   0x1 LB: > { %s2930_s25 = sadd.s32 4294967295, %s3716_s24   ;;  %p2934_p0 = scmp.ge.s32.totalorder %s3716_s24, 1  ;;  %s3716_s24 = sphi %s3761_s24, %s17_s24  }
   0x2   : > { %p247_p1 = scmp.lt.s32.totalorder %s3716_s24, 3 }
   0x4   : > { %p248_p2 = pnand %p2934_p0, %p247_p1 }
   0x6   : > { %251 = sbr.rel (%p248_p2) target bundleno = 618 (0x26a), region = 48 }
   0xd   : > { %p284_p3 = scmp.lt.s32.totalorder %s2930_s25, 1  ;;  %v3520_v0 = vld [vmem:[%s5132_s4 + $0x4] ss:$24 sps:$4 sm:$0xff]   ;;  %v3718_v1 = vmov 0   ;;  %v3518_v14 = vld [vmem:[%s5132_s4] ss:$24 sps:$4 sm:$0xff]  }
   0xe   : > { %3517 = vset.pattern.permute.xlu1 %v3718_v1  ;;  %3516 = vset.pattern.permute.xlu0 %v3718_v1  ;;  %v3523_v2 = vld [vmem:[%s5132_s4 + $0xc] ss:$24 sps:$4 sm:$0xff]   ;;  %v3521_v15 = vld [vmem:[%s5132_s4 + $0x8] ss:$24 sps:$4 sm:$0xff]   ;;  %v3526_v18 = vld [vmem:[%s5132_s4 + $0x3c] ss:$24 sps:$4 sm:$0xff]  }
   0xf   : > { %s5239_s25 = smov (!%p284_p3, %s2930_s25), 1  ;;  %1112 = vmatprep.mubr.bf16.mxu1 %v3520_v0  ;;  %1273 = vmatprep.mubr.bf16.mxu0 %v3523_v2  ;;  %v3524_v17 = vld [vmem:[%s5132_s4 + $0x34] ss:$24 sps:$4 sm:$0xff]   ;;  %v3528_v19 = vld [vmem:[%s5132_s4 + $0x30] ss:$24 sps:$4 sm:$0xff]   ;;  %v408_v28 = vld [vmem:[%s5133_s5] sm:$0xff] }
  0x10   : > { %s3504_s30 = smul.u32 48, %s5239_s25  ;;  %v3529_v20 = vld [vmem:[%s5132_s4 + $0x38] ss:$24 sps:$4 sm:$0xff]   ;;  %v3530_v21 = vld [vmem:[%s5132_s4 + $0x64] ss:$24 sps:$4 sm:$0xff]   ;;  %442 = vperm.xlu0 %3516, %v408_v28   ;;  %s3166_s18 = sshll.u32 %s5239_s25, 8 }
  0x11   : > { %v3532_v22 = vld [vmem:[%s5132_s4 + $0x6c] ss:$24 sps:$4 sm:$0xff]   ;;  %v3534_v23 = vld [vmem:[%s5132_s4 + $0x60] ss:$24 sps:$4 sm:$0xff]   ;;  %v3538_v26 = vld [vmem:[%s5132_s4 + $0x9c] ss:$24 sps:$4 sm:$0xff]   ;;  %s3833_s27 = scalar_lea.vmem %s5128_s0, %s3166_s18 }
  0x12   : > { %s293_s10 = scalar_lea.vmem %s5129_s1, %s3504_s30  ;;  %v3535_v24 = vld [vmem:[%s5132_s4 + $0x68] ss:$24 sps:$4 sm:$0xff]   ;;  %v3536_v25 = vld [vmem:[%s5132_s4 + $0x94] ss:$24 sps:$4 sm:$0xff]   ;;  %v411_v29 = vld [vmem:[%s5133_s5 + $0x18] sm:$0xff]  ;;  %s3719_s12 = smov 24  }
  0x13   : > { %v301_v3 = vld [vmem:[%s293_s10 + $0x8] sm:$0xff]  ;;  %v303_v4 = vld [vmem:[%s293_s10 + $0x18] sm:$0xff]  ;;  %v300_v5 = vld [vmem:[%s293_s10] sm:$0xff]  ;;  %s3167_s26 = sshll.u32 %s5239_s25, 7  ;;  %s3720_s8 = smov 16   ;;  %vm2396_vm0 = vcmask 125952  }
  0x14   : > { %v307_v6 = vpack.c.bf16 %v301_v3, %v301_v3  ;;  %v309_v7 = vpack.c.bf16 %v303_v4, %v303_v4  ;;  %v306_v8 = vpack.c.bf16 %v300_v5, %v300_v5  ;;  %v302_v9 = vld [vmem:[%s293_s10 + $0x10] sm:$0xff]  ;;  %v305_v10 = vld [vmem:[%s293_s10 + $0x28] sm:$0xff]  ;;  %v304_v13 = vld [vmem:[%s293_s10 + $0x20] sm:$0xff]  ;;  %s4713_s30 = scalar_lea.vmem %s5135_s7, %s3167_s26  ;;  %vm2621_vm1 = vcmask 191616  }
  0x15   : > { %v308_v11 = vpack.c.bf16 %v302_v9, %v302_v9  ;;  %v311_v12 = vpack.c.bf16 %v305_v10, %v305_v10  ;;  %v310_v16 = vpack.c.bf16 %v304_v13, %v304_v13  ;;  %v410_v27 = vld [vmem:[%s5133_s5 + $0x10] sm:$0xff]  ;;  %v409_v30 = vld [vmem:[%s5133_s5 + $0x8] sm:$0xff]  ;;  %v412_v32 = vld [vmem:[%s5133_s5 + $0x20] sm:$0xff]  ;;  %vm2830_vm2 = vcmask 199872  }
  0x16   : > { %1080 = vmatprep.subr.bf16.mxu1 %v307_v6  ;;  %1241 = vmatprep.subr.bf16.mxu0 %v309_v7  ;;  %v413_v31 = vld [vmem:[%s5133_s5 + $0x28] sm:$0xff]  ;;  %v3541_v34 = vld [vmem:[%s5132_s4 + $0x98] ss:$24 sps:$4 sm:$0xff]   ;;  %v3542_v35 = vld [vmem:[%s5132_s4 + $0xc4] ss:$24 sps:$4 sm:$0xff]  }
  0x17   : > { %1081 = vmatpush1.bf16.xpose.msra.mxu1 %v306_v8  ;;  %1242 = vmatpush1.bf16.xpose.msra.mxu0 %v308_v11  ;;  %v3540_v33 = vld [vmem:[%s5132_s4 + $0x90] ss:$24 sps:$4 sm:$0xff]   ;;  %v3544_v36 = vld [vmem:[%s5132_s4 + $0xcc] ss:$24 sps:$4 sm:$0xff]   ;;  %v415_v39 = vld [vmem:[%s5133_s5 + $0x38] sm:$0xff] }
  0x18   : > { %1402 = vmatprep.subr.bf16.mxu0 %v311_v12  ;;  %452 = vperm.xlu1 %3517, %v410_v27   ;;  %v1691_v37 = vld [vmem:[%s3833_s27 + $0x80] sm:$0xff]  ;;  %v1692_v38 = vld [vmem:[%s3833_s27 + $0x88] sm:$0xff]  ;;  %v414_v42 = vld [vmem:[%s5133_s5 + $0x30] sm:$0xff] }
  0x19   : > { %447 = vperm.xlu0 %3516, %v409_v30   ;;  %v1675_v40 = vld [vmem:[%s3833_s27] sm:$0xff]  ;;  %v1676_v41 = vld [vmem:[%s3833_s27 + $0x8] sm:$0xff]  ;;  %v1715_v43 = vpack.c.bf16 %v1692_v38, %v1691_v37  ;;  %v1693_v44 = vld [vmem:[%s3833_s27 + $0x90] sm:$0xff] }
  0x1a   : > { %v1694_v45 = vld [vmem:[%s3833_s27 + $0x98] sm:$0xff]  ;;  %v1707_v46 = vpack.c.bf16 %v1676_v41, %v1675_v40  ;;  %v417_v49 = vld [vmem:[%s5133_s5 + $0x48] sm:$0xff]  ;;  %v416_v50 = vld [vmem:[%s5133_s5 + $0x40] sm:$0xff] }
  0x1b   : > { %v1716_v47 = vpack.c.bf16 %v1694_v45, %v1693_v44  ;;  %v3546_v48 = vld [vmem:[%s5132_s4 + $0xc0] ss:$24 sps:$4 sm:$0xff]   ;;  %3264 = vmatprep.subr.bf16.mxu1 %v1715_v43  ;;  %v1677_v51 = vld [vmem:[%s3833_s27 + $0x10] sm:$0xff]  ;;  %v1696_v55 = vld [vmem:[%s3833_s27 + $0xa8] sm:$0xff] }
  0x1c   : > { %457 = vperm.xlu1 %3517, %v411_v29   ;;  %v1678_v52 = vld [vmem:[%s3833_s27 + $0x18] sm:$0xff]  ;;  %v3547_v53 = vld [vmem:[%s5132_s4 + $0xc8] ss:$24 sps:$4 sm:$0xff]   ;;  %v3548_v56 = vld [vmem:[%s5132_s4 + $0xf4] ss:$24 sps:$4 sm:$0xff]  }
  0x1d   : > { %462 = vperm.xlu0 %3516, %v412_v32   ;;  %v1695_v54 = vld [vmem:[%s3833_s27 + $0xa0] sm:$0xff]  ;;  %v3550_v57 = vld [vmem:[%s5132_s4 + $0xfc] ss:$24 sps:$4 sm:$0xff]   ;;  %v1708_v59 = vpack.c.bf16 %v1678_v52, %v1677_v51  ;;  %v1680_v62 = vld [vmem:[%s3833_s27 + $0x28] sm:$0xff] }
  0x1e   : > { %1113 = vmatmul.mubr.bf16.vlgmr.msra.gmra.mrb[0].mxu1 %v3518_v14  ;;  %1274 = vmatmul.mubr.bf16.vlgmr.msra.gmra.mrb[0].mxu0 %v3521_v15  ;;  %v419_v58 = vld [vmem:[%s5133_s5 + $0x58] sm:$0xff]  ;;  %v418_v60 = vld [vmem:[%s5133_s5 + $0x50] sm:$0xff]  ;;  %v1679_v61 = vld [vmem:[%s3833_s27 + $0x20] sm:$0xff]  ;;  %v1717_v63 = vpack.c.bf16 %v1696_v55, %v1695_v54 }
  0x1f   : > { %1403 = vmatpush1.bf16.xpose.msra.mxu0 %v310_v16  ;;  %1120 = vmatprep.mubr.bf16.mxu1 %v3524_v17  ;;  %v1697_v0 = vld [vmem:[%s3833_s27 + $0xb0] sm:$0xff]  ;;  %v1698_v1 = vld [vmem:[%s3833_s27 + $0xb8] sm:$0xff]  ;;  %v1709_v4 = vpack.c.bf16 %v1680_v62, %v1679_v61  ;;  %v421_v5 = vld [vmem:[%s5133_s5 + $0x68] sm:$0xff] }
  0x20   : > { %1281 = vmatprep.mubr.bf16.mxu0 %v3526_v18  ;;  %467 = vperm.xlu1 %3517, %v413_v31   ;;  %v3552_v2 = vld [vmem:[%s5132_s4 + $0xf0] ss:$24 sps:$4 sm:$0xff]   ;;  %v1718_v6 = vpack.c.bf16 %v1698_v1, %v1697_v0  ;;  %v1682_v8 = vld [vmem:[%s3833_s27 + $0x38] sm:$0xff]  ;;  %v420_v9 = vld [vmem:[%s5133_s5 + $0x60] sm:$0xff] }
  0x21   : > { %472 = vperm.xlu0 %3516, %v414_v42   ;;  %3265 = vmatpush3.bf16.msra.mxu1 %v1707_v46  ;;  %v3553_v3 = vld [vmem:[%s5132_s4 + $0xf8] ss:$24 sps:$4 sm:$0xff]   ;;  %v1699_v10 = vld [vmem:[%s3833_s27 + $0xc0] sm:$0xff]  ;;  %v1700_v11 = vld [vmem:[%s3833_s27 + $0xc8] sm:$0xff] }
  0x22   : > { %3266 = vmatprep.subr.bf16.mxu1 %v1716_v47  ;;  %v1681_v7 = vld [vmem:[%s3833_s27 + $0x30] sm:$0xff]  ;;  %v3554_v12 = vld [vmem:[%s5132_s4 + $0x124] ss:$24 sps:$4 sm:$0xff]   ;;  %v1719_v17 = vpack.c.bf16 %v1700_v11, %v1699_v10  ;;  %v1684_v18 = vld [vmem:[%s3833_s27 + $0x48] sm:$0xff] }
  0x23   : > { %v3556_v13 = vld [vmem:[%s5132_s4 + $0x12c] ss:$24 sps:$4 sm:$0xff]   ;;  %v423_v14 = vld [vmem:[%s5133_s5 + $0x78] sm:$0xff]  ;;  %v1710_v15 = vpack.c.bf16 %v1682_v8, %v1681_v7  ;;  %v1685_v28 = vld [vmem:[%s3833_s27 + $0x50] sm:$0xff] }
  0x24   : > { %477 = vperm.xlu1 %3517, %v415_v39   ;;  %v1683_v16 = vld [vmem:[%s3833_s27 + $0x40] sm:$0xff]  ;;  %v1686_v29 = vld [vmem:[%s3833_s27 + $0x58] sm:$0xff]  ;;  %v1704_v31 = vld [vmem:[%s3833_s27 + $0xe8] sm:$0xff] }
  0x25   : > { %482 = vperm.xlu0 %3516, %v416_v50   ;;  %3267 = vmatpush3.bf16.msra.mxu1 %v1708_v59  ;;  %v1703_v30 = vld [vmem:[%s3833_s27 + $0xe0] sm:$0xff]  ;;  %v3560_v32 = vld [vmem:[%s5132_s4 + $0x154] ss:$24 sps:$4 sm:$0xff]   ;;  %v1706_v41 = vld [vmem:[%s3833_s27 + $0xf8] sm:$0xff] }
  0x26   : > { %1121 = vmatmul.mubr.bf16.gmra.mrb[4].mxu1 %v3528_v19  ;;  %1282 = vmatmul.mubr.bf16.gmra.mrb[4].mxu0 %v3529_v20  ;;  %v422_v19 = vld [vmem:[%s5133_s5 + $0x70] sm:$0xff]  ;;  %v1721_v37 = vpack.c.bf16 %v1704_v31, %v1703_v30  ;;  %v1687_v38 = vld [vmem:[%s3833_s27 + $0x60] sm:$0xff]  ;;  %v1688_v39 = vld [vmem:[%s3833_s27 + $0x68] sm:$0xff] }
  0x27   : > { %1128 = vmatprep.mubr.bf16.mxu1 %v3530_v21  ;;  %1289 = vmatprep.mubr.bf16.mxu0 %v3532_v22  ;;  %v1701_v20 = vld [vmem:[%s3833_s27 + $0xd0] sm:$0xff]  ;;  %v1702_v21 = vld [vmem:[%s3833_s27 + $0xd8] sm:$0xff]  ;;  %v1713_v44 = vpack.c.bf16 %v1688_v39, %v1687_v38  ;;  %v429_v45 = vld [vmem:[%s5133_s5 + $0xa8] sm:$0xff] }
  0x28   : > { %487 = vperm.xlu1 %3517, %v417_v49   ;;  %3268 = vmatprep.subr.bf16.mxu1 %v1717_v63  ;;  %v3558_v22 = vld [vmem:[%s5132_s4 + $0x120] ss:$24 sps:$4 sm:$0xff]   ;;  %v1720_v27 = vpack.c.bf16 %v1702_v21, %v1701_v20  ;;  %v1705_v40 = vld [vmem:[%s3833_s27 + $0xf0] sm:$0xff]  ;;  %v3566_v49 = vld [vmem:[%s5132_s4 + $0x184] ss:$24 sps:$4 sm:$0xff]  }
  0x29   : > { %492 = vperm.xlu0 %3516, %v418_v60   ;;  %3269 = vmatpush3.bf16.msra.mxu1 %v1709_v4  ;;  %v3564_v42 = vld [vmem:[%s5132_s4 + $0x150] ss:$24 sps:$4 sm:$0xff]   ;;  %v1722_v46 = vpack.c.bf16 %v1706_v41, %v1705_v40  ;;  %v428_v50 = vld [vmem:[%s5133_s5 + $0xa0] sm:$0xff]  ;;  %v3574_v60 = vld [vmem:[%s5132_s4 + $0x1bc] ss:$24 sps:$4 sm:$0xff]  }
  0x2a   : > { %3270 = vmatprep.subr.bf16.mxu1 %v1718_v6  ;;  %v3565_v43 = vld [vmem:[%s5132_s4 + $0x158] ss:$24 sps:$4 sm:$0xff]   ;;  %v3568_v51 = vld [vmem:[%s5132_s4 + $0x18c] ss:$24 sps:$4 sm:$0xff]   ;;  %v3583_v8 = vld [vmem:[%s5132_s4 + $0x1e8] ss:$24 sps:$4 sm:$0xff]  }
  0x2b   : > { %v1689_v47 = vld [vmem:[%s3833_s27 + $0x70] sm:$0xff]  ;;  %v3570_v55 = vld [vmem:[%s5132_s4 + $0x180] ss:$24 sps:$4 sm:$0xff]   ;;  %v437_v1 = vld [vmem:[%s5133_s5 + $0xe8] sm:$0xff] }
  0x2c   : > { %497 = vperm.xlu1 %3517, %v419_v58   ;;  %v430_v54 = vld [vmem:[%s5133_s5 + $0xb0] sm:$0xff]  ;;  %v432_v59 = vld [vmem:[%s5133_s5 + $0xc0] sm:$0xff]  ;;  %v435_v61 = vld [vmem:[%s5133_s5 + $0xd8] sm:$0xff] }
  0x2d   : > { %502 = vperm.xlu0 %3516, %v420_v9   ;;  %3271 = vmatpush3.bf16.msra.mxu1 %v1710_v15  ;;  %v3572_v58 = vld [vmem:[%s5132_s4 + $0x1b4] ss:$24 sps:$4 sm:$0xff]   ;;  %v3576_v63 = vld [vmem:[%s5132_s4 + $0x1b0] ss:$24 sps:$4 sm:$0xff]   ;;  %v3582_v7 = vld [vmem:[%s5132_s4 + $0x1e0] ss:$24 sps:$4 sm:$0xff]  }
  0x2e   : > { %1129 = vmatmul.mubr.bf16.gmra.mrb[8].mxu1 %v3534_v23  ;;  %1290 = vmatmul.mubr.bf16.gmra.mrb[8].mxu0 %v3535_v24  ;;  %v3559_v23 = vld [vmem:[%s5132_s4 + $0x128] ss:$24 sps:$4 sm:$0xff]   ;;  %v1711_v24 = vpack.c.bf16 %v1684_v18, %v1683_v16  ;;  %v434_v62 = vld [vmem:[%s5133_s5 + $0xd0] sm:$0xff]  ;;  %v3580_v4 = vld [vmem:[%s5132_s4 + $0x1ec] ss:$24 sps:$4 sm:$0xff]  }
  0x2f   : > { %1136 = vmatprep.mubr.bf16.mxu1 %v3536_v25  ;;  %1297 = vmatprep.mubr.bf16.mxu0 %v3538_v26  ;;  %v425_v25 = vld [vmem:[%s5133_s5 + $0x88] sm:$0xff]  ;;  %v424_v26 = vld [vmem:[%s5133_s5 + $0x80] sm:$0xff]  ;;  %v3577_v0 = vld [vmem:[%s5132_s4 + $0x1b8] ss:$24 sps:$4 sm:$0xff]  }
  0x30   : > { %507 = vperm.xlu1 %3517, %v421_v5   ;;  %3272 = vmatprep.subr.bf16.mxu1 %v1719_v17  ;;  %v439_v5 = vld [vmem:[%s5133_s5 + $0xf8] sm:$0xff]  ;;  %v438_v6 = vld [vmem:[%s5133_s5 + $0xf0] sm:$0xff]  ;;  %v1724_v9 = vld [vmem:[%s5131_s3 + $0x8] sm:$0xff] }
  0x31   : > { %512 = vperm.xlu0 %3516, %v422_v19   ;;  %3273 = vmatpush3.bf16.msra.mxu1 %v1711_v24  ;;  %v3584_v10 = vld [vmem:[%s5132_s4 + $0x214] ss:$24 sps:$4 sm:$0xff]   ;;  %v1723_v11 = vld [vmem:[%s5131_s3] sm:$0xff]  ;;  %v3588_v15 = vld [vmem:[%s5132_s4 + $0x210] ss:$24 sps:$4 sm:$0xff]  }
  0x32   : > { %3274 = vmatprep.subr.bf16.mxu1 %v1720_v27  ;;  %v3589_v16 = vld [vmem:[%s5132_s4 + $0x218] ss:$24 sps:$4 sm:$0xff]   ;;  %v1728_v17 = vld [vmem:[%s5131_s3 + $0x28] sm:$0xff]  ;;  %v3590_v18 = vld [vmem:[%s5132_s4 + $0x244] ss:$24 sps:$4 sm:$0xff]  }
  0x33   : > { %v1727_v19 = vld [vmem:[%s5131_s3 + $0x20] sm:$0xff]  ;;  %v1730_v21 = vld [vmem:[%s5131_s3 + $0x38] sm:$0xff]  ;;  %v1733_v30 = vld [vmem:[%s5131_s3 + $0x50] sm:$0xff] }
  0x34   : > { %517 = vperm.xlu1 %3517, %v423_v14   ;;  %v1725_v14 = vld [vmem:[%s5131_s3 + $0x10] sm:$0xff]  ;;  %v3592_v20 = vld [vmem:[%s5132_s4 + $0x24c] ss:$24 sps:$4 sm:$0xff]   ;;  %v3595_v24 = vld [vmem:[%s5132_s4 + $0x248] ss:$24 sps:$4 sm:$0xff]  }
  0x35   : > { %522 = vperm.xlu0 %3516, %v424_v26   ;;  %v1732_v26 = vld [vmem:[%s5131_s3 + $0x48] sm:$0xff]  ;;  %v3598_v27 = vld [vmem:[%s5132_s4 + $0x27c] ss:$24 sps:$4 sm:$0xff]   ;;  %v3606_v40 = vld [vmem:[%s5132_s4 + $0x2a0] ss:$24 sps:$4 sm:$0xff]  }
  0x36   : > { %1137 = vmatmul.mubr.bf16.gmra.mrb[12].mxu1 %v3540_v33  ;;  %1298 = vmatmul.mubr.bf16.gmra.mrb[12].mxu0 %v3541_v34  ;;  %v3562_v33 = vld [vmem:[%s5132_s4 + $0x15c] ss:$24 sps:$4 sm:$0xff]   ;;  %v1712_v34 = vpack.c.bf16 %v1686_v29, %v1685_v28  ;;  %v1731_v28 = vld [vmem:[%s5131_s3 + $0x40] sm:$0xff]  ;;  %v1736_v31 = vld [vmem:[%s5131_s3 + $0x68] sm:$0xff] }
  0x37   : > { %1144 = vmatprep.mubr.bf16.mxu1 %v3542_v35  ;;  %1305 = vmatprep.mubr.bf16.mxu0 %v3544_v36  ;;  %v427_v35 = vld [vmem:[%s5133_s5 + $0x98] sm:$0xff]  ;;  %v426_v36 = vld [vmem:[%s5133_s5 + $0x90] sm:$0xff]  ;;  %v1740_v39 = vld [vmem:[%s5131_s3 + $0x88] sm:$0xff] }
  0x38   : > { %527 = vperm.xlu1 %3517, %v425_v25   ;;  %3275 = vmatpush3.bf16.msra.mxu1 %v1712_v34  ;;  %v3596_v25 = vld [vmem:[%s5132_s4 + $0x274] ss:$24 sps:$4 sm:$0xff]   ;;  %v1734_v29 = vld [vmem:[%s5131_s3 + $0x58] sm:$0xff]  ;;  %v1735_v34 = vld [vmem:[%s5131_s3 + $0x60] sm:$0xff] }
  0x39   : > { %532 = vperm.xlu0 %3516, %v426_v36   ;;  %3276 = vmatprep.subr.bf16.mxu1 %v1721_v37  ;;  %v3604_v36 = vld [vmem:[%s5132_s4 + $0x2ac] ss:$24 sps:$4 sm:$0xff]   ;;  %v1738_v37 = vld [vmem:[%s5131_s3 + $0x78] sm:$0xff]  ;;  %v1737_v38 = vld [vmem:[%s5131_s3 + $0x70] sm:$0xff] }
  0x3a   : > { %v3607_v41 = vld [vmem:[%s5132_s4 + $0x2a8] ss:$24 sps:$4 sm:$0xff]  }
  0x3c   : > { %537 = vperm.xlu1 %3517, %v427_v35   ;;  %3277 = vmatpush3.bf16.msra.mxu1 %v1713_v44  ;;  %v3602_v35 = vld [vmem:[%s5132_s4 + $0x2a4] ss:$24 sps:$4 sm:$0xff]  }
  0x3d   : > { %542 = vperm.xlu0 %3516, %v428_v50   ;;  %3278 = vmatprep.subr.bf16.mxu1 %v1722_v46  ;;  %v3610_v44 = vld [vmem:[%s5132_s4 + $0x2dc] ss:$24 sps:$4 sm:$0xff]   ;;  %v1743_v50 = vld [vmem:[%s5131_s3 + $0xa0] sm:$0xff] }
  0x3e   : > { %1145 = vmatmul.mubr.bf16.gmra.mrb[16].mxu1 %v3546_v48  ;;  %1306 = vmatmul.mubr.bf16.gmra.mrb[16].mxu0 %v3547_v53  ;;  %v1690_v48 = vld [vmem:[%s3833_s27 + $0x78] sm:$0xff]  ;;  %v1741_v46 = vld [vmem:[%s5131_s3 + $0x90] sm:$0xff] }
  0x3f   : > { %1152 = vmatprep.mubr.bf16.mxu1 %v3548_v56  ;;  %1313 = vmatprep.mubr.bf16.mxu0 %v3550_v57  ;;  %v1714_v52 = vpack.c.bf16 %v1690_v48, %v1689_v47  ;;  %v431_v53 = vld [vmem:[%s5133_s5 + $0xb8] sm:$0xff]  ;;  %v3571_v56 = vld [vmem:[%s5132_s4 + $0x188] ss:$24 sps:$4 sm:$0xff]  }
  0x40   : > { %547 = vperm.xlu1 %3517, %v429_v45   ;;  %v433_v57 = vld [vmem:[%s5133_s5 + $0xc8] sm:$0xff]  ;;  %v1742_v45 = vld [vmem:[%s5131_s3 + $0x98] sm:$0xff] }
  0x41   : > { %3279 = vmatpush3.bf16.msra.mxu1 %v1714_v52  ;;  %552 = vperm.xlu0 %3516, %v430_v54   ;;  %v1744_v47 = vld [vmem:[%s5131_s3 + $0xa8] sm:$0xff]  ;;  %v1745_v54 = vld [vmem:[%s5131_s3 + $0xb0] sm:$0xff] }
  0x42   : > { %v3612_v48 = vld [vmem:[%s5132_s4 + $0x2d0] ss:$24 sps:$4 sm:$0xff]   ;;  %v3619_v52 = vld [vmem:[%s5130_s2 + $0x4] ss:$8 sps:$4 sm:$0xff]  }
  0x44   : > { %557 = vperm.xlu1 %3517, %v431_v53   ;;  %v1746_v53 = vld [vmem:[%s5131_s3 + $0xb8] sm:$0xff] }
  0x45   : > { %562 = vperm.xlu0 %3516, %v432_v59   ;;  %v3620_v59 = vld [vmem:[%s5132_s4 + $0x44] ss:$24 sps:$4 sm:$0xff]  }
  0x46   : > { %1153 = vmatmul.mubr.bf16.gmra.mrb[20].mxu1 %v3552_v2  ;;  %1314 = vmatmul.mubr.bf16.gmra.mrb[20].mxu0 %v3553_v3  ;;  %v3578_v2 = vld [vmem:[%s5132_s4 + $0x1e4] ss:$24 sps:$4 sm:$0xff]  }
  0x47   : > { %1160 = vmatprep.mubr.bf16.mxu1 %v3554_v12  ;;  %1321 = vmatprep.mubr.bf16.mxu0 %v3556_v13  ;;  %v436_v3 = vld [vmem:[%s5133_s5 + $0xe0] sm:$0xff]  ;;  %v3586_v12 = vld [vmem:[%s5132_s4 + $0x21c] ss:$24 sps:$4 sm:$0xff]  }
  0x48   : > { %567 = vperm.xlu1 %3517, %v433_v57   ;;  %v1726_v13 = vld [vmem:[%s5131_s3 + $0x18] sm:$0xff]  ;;  %v3617_v57 = vld [vmem:[%s5130_s2] ss:$8 sps:$4 sm:$0xff]  }
  0x49   : > { %572 = vperm.xlu0 %3516, %v434_v62   ;;  %v1749_v62 = vld [vmem:[%s5131_s3 + $0xd0] sm:$0xff] }
  0x4c   : > { %577 = vperm.xlu1 %3517, %v435_v61   ;;  %v1750_v61 = vld [vmem:[%s5131_s3 + $0xd8] sm:$0xff] }
  0x4d   : > { %582 = vperm.xlu0 %3516, %v436_v3   ;;  %v3626_v3 = vld [vmem:[%s5132_s4 + $0x74] ss:$24 sps:$4 sm:$0xff]  }
  0x4e   : > { %1161 = vmatmul.mubr.bf16.gmra.mrb[24].mxu1 %v3558_v22  ;;  %1322 = vmatmul.mubr.bf16.gmra.mrb[24].mxu0 %v3559_v23  ;;  %v1729_v22 = vld [vmem:[%s5131_s3 + $0x30] sm:$0xff]  ;;  %v3594_v23 = vld [vmem:[%s5132_s4 + $0x240] ss:$24 sps:$4 sm:$0xff]  }
  0x4f   : > { %1168 = vmatprep.mubr.bf16.mxu1 %v3560_v32  ;;  %1329 = vmatprep.mubr.bf16.mxu0 %v3562_v33  ;;  %v3600_v32 = vld [vmem:[%s5132_s4 + $0x270] ss:$24 sps:$4 sm:$0xff]  }
  0x50   : > { %587 = vperm.xlu1 %3517, %v437_v1   ;;  %v3601_v33 = vld [vmem:[%s5132_s4 + $0x278] ss:$24 sps:$4 sm:$0xff]  }
  0x51   : > { %592 = vperm.xlu0 %3516, %v438_v6   ;;  %v3625_v1 = vld [vmem:[%s5130_s2 + $0x10] ss:$8 sps:$4 sm:$0xff]   ;;  %v1596_v6 = vld [vmem:[%s5134_s6 + $0x8] sm:$0xff] }
  0x54   : > { %597 = vperm.xlu1 %3517, %v439_v5   ;;  %v1754_v5 = vld [vmem:[%s5131_s3 + $0xf8] sm:$0xff] }
  0x55   : > { %1757 = vperm.xlu0 %3516, %v1723_v11   ;;  %v1598_v11 = vld [vmem:[%s5134_s6 + $0x18] sm:$0xff] }
  0x56   : > { %1169 = vmatmul.mubr.bf16.gmra.mrb[28].mxu1 %v3564_v42  ;;  %1330 = vmatmul.mubr.bf16.gmra.mrb[28].mxu0 %v3565_v43  ;;  %v1739_v42 = vld [vmem:[%s5131_s3 + $0x80] sm:$0xff]  ;;  %v3608_v43 = vld [vmem:[%s5132_s4 + $0x2d4] ss:$24 sps:$4 sm:$0xff]  }
  0x57   : > { %1176 = vmatprep.mubr.bf16.mxu1 %v3566_v49  ;;  %1337 = vmatprep.mubr.bf16.mxu0 %v3568_v51  ;;  %v3613_v49 = vld [vmem:[%s5132_s4 + $0x2d8] ss:$24 sps:$4 sm:$0xff]   ;;  %v3616_v51 = vld [vmem:[%s5132_s4 + $0x14] ss:$24 sps:$4 sm:$0xff]  }
  0x58   : > { %1762 = vperm.xlu1 %3517, %v1724_v9   ;;  %v3233_v9 = vpack.c.bf16 %v1596_v6, %v1596_v6  ;;  %v1612_v6 = vld [vmem:[%s5134_s6 + $0x88] sm:$0xff] }
  0x59   : > { %1767 = vperm.xlu0 %3516, %v1725_v14   ;;  %v1597_v14 = vld [vmem:[%s5134_s6 + $0x10] sm:$0xff] }
  0x5c   : > { %1772 = vperm.xlu1 %3517, %v1726_v13   ;;  %v3631_v13 = vld [vmem:[%s5130_s2 + $0x20] ss:$8 sps:$4 sm:$0xff]  }
  0x5d   : > { %1777 = vperm.xlu0 %3516, %v1727_v19   ;;  %v1600_v19 = vld [vmem:[%s5134_s6 + $0x28] sm:$0xff] }
  0x5e   : > { %1177 = vmatmul.mubr.bf16.gmra.mrb[32].mxu1 %v3570_v55  ;;  %1338 = vmatmul.mubr.bf16.gmra.mrb[32].mxu0 %v3571_v56  ;;  %v1748_v55 = vld [vmem:[%s5131_s3 + $0xc8] sm:$0xff] }
  0x5f   : > { %1184 = vmatprep.mubr.bf16.mxu1 %v3572_v58  ;;  %1345 = vmatprep.mubr.bf16.mxu0 %v3574_v60  ;;  %v3614_v56 = vld [vmem:[%s5132_s4 + $0x10] ss:$24 sps:$4 sm:$0xff]   ;;  %v1747_v58 = vld [vmem:[%s5131_s3 + $0xc0] sm:$0xff]  ;;  %v3622_v60 = vld [vmem:[%s5130_s2 + $0x14] ss:$8 sps:$4 sm:$0xff]  }
  0x60   : > { %1782 = vperm.xlu1 %3517, %v1728_v17   ;;  %v3235_v17 = vpack.c.bf16 %v1598_v11, %v1598_v11  ;;  %v3661_v11 = vld [vmem:[%s5130_s2 + $0x70] ss:$8 sps:$4 sm:$0xff]  }
  0x61   : > { %1787 = vperm.xlu0 %3516, %v1729_v22  }
  0x64   : > { %1792 = vperm.xlu1 %3517, %v1730_v21   ;;  %v3237_v21 = vpack.c.bf16 %v1600_v19, %v1600_v19 }
  0x65   : > { %1797 = vperm.xlu0 %3516, %v1731_v28   ;;  %v3638_v28 = vld [vmem:[%s5132_s4 + $0xd4] ss:$24 sps:$4 sm:$0xff]  }
  0x66   : > { %1185 = vmatmul.mubr.bf16.gmra.mrb[36].mxu1 %v3576_v63  ;;  %1346 = vmatmul.mubr.bf16.gmra.mrb[36].mxu0 %v3577_v0  ;;  %v1752_v63 = vld [vmem:[%s5131_s3 + $0xe8] sm:$0xff]  ;;  %v3624_v0 = vld [vmem:[%s5132_s4 + $0x40] ss:$24 sps:$4 sm:$0xff]  }
  0x67   : > { %1192 = vmatprep.mubr.bf16.mxu1 %v3578_v2  ;;  %1353 = vmatprep.mubr.bf16.mxu0 %v3580_v4  ;;  %v1751_v2 = vld [vmem:[%s5131_s3 + $0xe0] sm:$0xff] }
  0x68   : > { %1802 = vperm.xlu1 %3517, %v1732_v26   ;;  %v3628_v4 = vld [vmem:[%s5130_s2 + $0x24] ss:$8 sps:$4 sm:$0xff]  }
  0x69   : > { %1807 = vperm.xlu0 %3516, %v1733_v30  }
  0x6c   : > { %1812 = vperm.xlu1 %3517, %v1734_v29   ;;  %v3640_v29 = vld [vmem:[%s5130_s2 + $0x44] ss:$8 sps:$4 sm:$0xff]  }
  0x6d   : > { %1817 = vperm.xlu0 %3516, %v1735_v34   ;;  %v1603_v34 = vld [vmem:[%s5134_s6 + $0x40] sm:$0xff] }
  0x6e   : > { %1193 = vmatmul.mubr.bf16.gmra.mrb[40].mxu1 %v3582_v7  ;;  %1354 = vmatmul.mubr.bf16.gmra.mrb[40].mxu0 %v3583_v8  ;;  %v1753_v7 = vld [vmem:[%s5131_s3 + $0xf0] sm:$0xff]  ;;  %v1595_v8 = vld [vmem:[%s5134_s6] sm:$0xff] }
  0x6f   : > { %1200 = vmatprep.mubr.bf16.mxu1 %v3584_v10  ;;  %1361 = vmatprep.mubr.bf16.mxu0 %v3586_v12  ;;  %v3232_v10 = vpack.c.bf16 %v1595_v8, %v1595_v8  ;;  %v3630_v12 = vld [vmem:[%s5132_s4 + $0x70] ss:$24 sps:$4 sm:$0xff]  }
  0x70   : > { %1822 = vperm.xlu1 %3517, %v1736_v31  }
  0x71   : > { %1827 = vperm.xlu0 %3516, %v1737_v38   ;;  %v1606_v38 = vld [vmem:[%s5134_s6 + $0x58] sm:$0xff] }
  0x74   : > { %1832 = vperm.xlu1 %3517, %v1738_v37   ;;  %v3240_v37 = vpack.c.bf16 %v1603_v34, %v1603_v34  ;;  %v3673_v34 = vld [vmem:[%s5130_s2 + $0x90] ss:$8 sps:$4 sm:$0xff]  }
  0x75   : > { %1837 = vperm.xlu0 %3516, %v1739_v42   ;;  %v3644_v42 = vld [vmem:[%s5132_s4 + $0x104] ss:$24 sps:$4 sm:$0xff]  }
  0x76   : > { %1201 = vmatmul.mubr.bf16.gmra.mrb[44].mxu1 %v3588_v15  ;;  %1362 = vmatmul.mubr.bf16.gmra.mrb[44].mxu0 %v3589_v16  ;;  %v3632_v15 = vld [vmem:[%s5132_s4 + $0xa4] ss:$24 sps:$4 sm:$0xff]  }
  0x77   : > { %1208 = vmatprep.mubr.bf16.mxu1 %v3590_v18  ;;  %1369 = vmatprep.mubr.bf16.mxu0 %v3592_v20  ;;  %v3634_v16 = vld [vmem:[%s5130_s2 + $0x34] ss:$8 sps:$4 sm:$0xff]   ;;  %v3234_v18 = vpack.c.bf16 %v1597_v14, %v1597_v14  ;;  %v1599_v20 = vld [vmem:[%s5134_s6 + $0x20] sm:$0xff] }
  0x78   : > { %1842 = vperm.xlu1 %3517, %v1740_v39   ;;  %v3236_v22 = vpack.c.bf16 %v1599_v20, %v1599_v20  ;;  %v3642_v39 = vld [vmem:[%s5132_s4 + $0xd0] ss:$24 sps:$4 sm:$0xff]   ;;  %v3664_v14 = vld [vmem:[%s5130_s2 + $0x84] ss:$8 sps:$4 sm:$0xff]  }
  0x79   : > { %1847 = vperm.xlu0 %3516, %v1741_v46   ;;  %v3666_v20 = vld [vmem:[%s5132_s4 + $0x190] ss:$24 sps:$4 sm:$0xff]  }
  0x7c   : > { %1852 = vperm.xlu1 %3517, %v1742_v45   ;;  %v3243_v45 = vpack.c.bf16 %v1606_v38, %v1606_v38  ;;  %v3674_v38 = vld [vmem:[%s5132_s4 + $0x1f4] ss:$24 sps:$4 sm:$0xff]  }
  0x7d   : > { %1857 = vperm.xlu0 %3516, %v1743_v50  }
  0x7e   : > { %1209 = vmatmul.mubr.bf16.gmra.mrb[48].mxu1 %v3594_v23  ;;  %1370 = vmatmul.mubr.bf16.gmra.mrb[48].mxu0 %v3595_v24  ;;  %v1602_v23 = vld [vmem:[%s5134_s6 + $0x38] sm:$0xff] }
  0x7f   : > { %1216 = vmatprep.mubr.bf16.mxu1 %v3596_v25  ;;  %1377 = vmatprep.mubr.bf16.mxu0 %v3598_v27  ;;  %v3636_v24 = vld [vmem:[%s5132_s4 + $0xa0] ss:$24 sps:$4 sm:$0xff]   ;;  %v1601_v27 = vld [vmem:[%s5134_s6 + $0x30] sm:$0xff]  ;;  %v3239_v30 = vpack.c.bf16 %v1602_v23, %v1602_v23 }
  0x80   : > { %1862 = vperm.xlu1 %3517, %v1744_v47   ;;  %v3637_v25 = vld [vmem:[%s5130_s2 + $0x30] ss:$8 sps:$4 sm:$0xff]   ;;  %v3238_v31 = vpack.c.bf16 %v1601_v27, %v1601_v27  ;;  %v1608_v47 = vld [vmem:[%s5134_s6 + $0x68] sm:$0xff]  ;;  %v1615_v23 = vld [vmem:[%s5134_s6 + $0xa0] sm:$0xff] }
  0x81   : > { %1867 = vperm.xlu0 %3516, %v1745_v54   ;;  %v3245_v50 = vpack.c.bf16 %v1608_v47, %v1608_v47  ;;  %v3252_v27 = vpack.c.bf16 %v1615_v23, %v1615_v23  ;;  %v3678_v47 = vld [vmem:[%s5132_s4 + $0x1f0] ss:$24 sps:$4 sm:$0xff]  }
  0x82   : > { %v3691_v23 = vld [vmem:[%s5130_s2 + $0xc0] ss:$8 sps:$4 sm:$0xff]  }
  0x84   : > { %1872 = vperm.xlu1 %3517, %v1746_v53   ;;  %v3649_v53 = vld [vmem:[%s5130_s2 + $0x50] ss:$8 sps:$4 sm:$0xff]  }
  0x85   : > { %1877 = vperm.xlu0 %3516, %v1747_v58  }
  0x86   : > { %1217 = vmatmul.mubr.bf16.gmra.mrb[52].mxu1 %v3600_v32  ;;  %1378 = vmatmul.mubr.bf16.gmra.mrb[52].mxu0 %v3601_v33  ;;  %v1604_v32 = vld [vmem:[%s5134_s6 + $0x48] sm:$0xff] }
  0x87   : > { %1224 = vmatprep.mubr.bf16.mxu1 %v3602_v35  ;;  %1385 = vmatprep.mubr.bf16.mxu0 %v3604_v36  ;;  %v3241_v36 = vpack.c.bf16 %v1604_v32, %v1604_v32  ;;  %v3672_v32 = vld [vmem:[%s5132_s4 + $0x1c0] ss:$24 sps:$4 sm:$0xff]  }
  0x88   : > { %1882 = vperm.xlu1 %3517, %v1748_v55   ;;  %v1609_v55 = vld [vmem:[%s5134_s6 + $0x70] sm:$0xff] }
  0x89   : > { %1887 = vperm.xlu0 %3516, %v1749_v62  }
  0x8c   : > { %1892 = vperm.xlu1 %3517, %v1750_v61  }
  0x8d   : > { %1897 = vperm.xlu0 %3516, %v1751_v2   ;;  %v1611_v2 = vld [vmem:[%s5134_s6 + $0x80] sm:$0xff] }
  0x8e   : > { %1225 = vmatmul.mubr.bf16.gmra.mrb[56].mxu1 %v3606_v40  ;;  %1386 = vmatmul.mubr.bf16.gmra.mrb[56].mxu0 %v3607_v41  ;;  %v3643_v40 = vld [vmem:[%s5130_s2 + $0x40] ss:$8 sps:$4 sm:$0xff]   ;;  %v1605_v41 = vld [vmem:[%s5134_s6 + $0x50] sm:$0xff] }
  0x8f   : > { %1232 = vmatprep.mubr.bf16.mxu1 %v3608_v43  ;;  %1393 = vmatprep.mubr.bf16.mxu0 %v3610_v44  ;;  %v4270_v26 = vpop.permute.xlu0 %442  ;;  %v3646_v43 = vld [vmem:[%s5130_s2 + $0x54] ss:$8 sps:$4 sm:$0xff]   ;;  %v3242_v46 = vpack.c.bf16 %v1605_v41, %v1605_v41 }
  0x90   : > { %1902 = vperm.xlu1 %3517, %v1752_v63   ;;  %v3654_v63 = vld [vmem:[%s5132_s4 + $0x130] ss:$24 sps:$4 sm:$0xff]   ;;  %v1618_v41 = vld [vmem:[%s5134_s6 + $0xb8] sm:$0xff] }
  0x91   : > { %1907 = vperm.xlu0 %3516, %v1753_v7   ;;  %v3249_v7 = vpack.c.bf16 %v1612_v6, %v1612_v6 }
  0x94   : > { %1912 = vperm.xlu1 %3517, %v1754_v5   ;;  %v3248_v5 = vpack.c.bf16 %v1611_v2, %v1611_v2  ;;  %v1623_v2 = vld [vmem:[%s5134_s6 + $0xe0] sm:$0xff] }
  0x95   : > { %2734 = vrot.lane.b32.xlu0 %v3232_v10, %s3719_s12  ;;  %v3660_v10 = vld [vmem:[%s5132_s4 + $0x160] ss:$24 sps:$4 sm:$0xff]  }
  0x96   : > { %1233 = vmatmul.mubr.bf16.gmra.mrb[60].mxu1 %v3612_v48  ;;  %1394 = vmatmul.mubr.bf16.gmra.mrb[60].mxu0 %v3613_v49  ;;  %v1607_v49 = vld [vmem:[%s5134_s6 + $0x60] sm:$0xff] }
  0x97   : > { %1434 = vmatprep.mubr.bf16.mxu0 %v3616_v51  ;;  %2107 = vmatprep.mubr.bf16.mxu1 %v3619_v52  ;;  %v4286_v33 = vpop.permute.xlu1 %452  ;;  %v3244_v51 = vpack.c.bf16 %v1607_v49, %v1607_v49  ;;  %v3648_v52 = vld [vmem:[%s5132_s4 + $0x100] ss:$24 sps:$4 sm:$0xff]  }
  0x98   : > { %2736 = vrot.lane.b32.xlu1 %v3233_v9, %s3719_s12  ;;  %v4291_v35 = vpop.permute.xlu0 %447  ;;  %v3679_v49 = vld [vmem:[%s5130_s2 + $0xa0] ss:$8 sps:$4 sm:$0xff]  }
  0x99   : > { %2738 = vrot.lane.b32.xlu0 %v3234_v18, %s3719_s12 }
  0x9b   : > { %v4313_v44 = vpop.permute.xlu1 %457 }
  0x9c   : > { %2740 = vrot.lane.b32.xlu1 %v3235_v17, %s3719_s12  ;;  %v4320_v48 = vpop.permute.xlu0 %462  ;;  %v1614_v17 = vld [vmem:[%s5134_s6 + $0x98] sm:$0xff] }
  0x9d   : > { %2742 = vrot.lane.b32.xlu0 %v3236_v22, %s3719_s12  ;;  %v3251_v18 = vpack.c.bf16 %v1614_v17, %v1614_v17 }
  0x9e   : > { %1435 = vmatmul.mubr.bf16.vlgmr.msra.gmra.mrb[0].mxu0 %v3614_v56  ;;  %2108 = vmatmul.mubr.bf16.vlgmr.msra.gmra.mrb[64].mxu1 %v3617_v57  ;;  %v3650_v56 = vld [vmem:[%s5132_s4 + $0x134] ss:$24 sps:$4 sm:$0xff]  }
  0x9f   : > { %1442 = vmatprep.mubr.bf16.mxu0 %v3620_v59  ;;  %2115 = vmatprep.mubr.bf16.mxu1 %v3622_v60  ;;  %v4333_v54 = vpop.permute.xlu1 %467  ;;  %v3652_v57 = vld [vmem:[%s5130_s2 + $0x64] ss:$8 sps:$4 sm:$0xff]   ;;  %v1610_v59 = vld [vmem:[%s5134_s6 + $0x78] sm:$0xff]  ;;  %v3246_v60 = vpack.c.bf16 %v1609_v55, %v1609_v55 }
  0xa0   : > { %2744 = vrot.lane.b32.xlu1 %v3237_v21, %s3719_s12  ;;  %v4344_v58 = vpop.permute.xlu0 %472  ;;  %v3247_v61 = vpack.c.bf16 %v1610_v59, %v1610_v59  ;;  %v3667_v21 = vld [vmem:[%s5130_s2 + $0x80] ss:$8 sps:$4 sm:$0xff]  }
  0xa1   : > { %2746 = vrot.lane.b32.xlu0 %v3238_v31, %s3719_s12 }
  0xa3   : > { %v4351_v62 = vpop.permute.xlu1 %477 }
  0xa4   : > { %2748 = vrot.lane.b32.xlu1 %v3239_v30, %s3719_s12 }
  0xa5   : > { %2750 = vrot.lane.b32.xlu0 %v3240_v37, %s3719_s12  ;;  %v1617_v37 = vld [vmem:[%s5134_s6 + $0xb0] sm:$0xff] }
  0xa6   : > { %1443 = vmatmul.mubr.bf16.gmra.mrb[4].mxu0 %v3624_v0  ;;  %2116 = vmatmul.mubr.bf16.gmra.mrb[68].mxu1 %v3625_v1  ;;  %v3655_v0 = vld [vmem:[%s5130_s2 + $0x60] ss:$8 sps:$4 sm:$0xff]   ;;  %v4361_v1 = vpop.permute.xlu0 %482 }
  0xa7   : > { %1450 = vmatprep.mubr.bf16.mxu0 %v3626_v3  ;;  %2123 = vmatprep.mubr.bf16.mxu1 %v3628_v4  ;;  %v3656_v3 = vld [vmem:[%s5132_s4 + $0x164] ss:$24 sps:$4 sm:$0xff]   ;;  %v4376_v8 = vpop.permute.xlu1 %487 }
  0xa8   : > { %2752 = vrot.lane.b32.xlu1 %v3241_v36, %s3719_s12  ;;  %v3658_v4 = vld [vmem:[%s5130_s2 + $0x74] ss:$8 sps:$4 sm:$0xff]  }
  0xa9   : > { %2754 = vrot.lane.b32.xlu0 %v3242_v46, %s3719_s12  ;;  %v1619_v46 = vld [vmem:[%s5134_s6 + $0xc0] sm:$0xff] }
  0xaa   : > { %v4378_v9 = vpop.permute.xlu0 %492 }
  0xac   : > { %2756 = vrot.lane.b32.xlu1 %v3243_v45, %s3719_s12 }
  0xad   : > { %2758 = vrot.lane.b32.xlu0 %v3244_v51, %s3719_s12  ;;  %v3680_v51 = vld [vmem:[%s5132_s4 + $0x224] ss:$24 sps:$4 sm:$0xff]  }
  0xae   : > { %1451 = vmatmul.mubr.bf16.gmra.mrb[8].mxu0 %v3630_v12  ;;  %2124 = vmatmul.mubr.bf16.gmra.mrb[72].mxu1 %v3631_v13  ;;  %v1613_v12 = vld [vmem:[%s5134_s6 + $0x90] sm:$0xff]  ;;  %v4402_v19 = vpop.permute.xlu0 %502 }
  0xaf   : > { %1458 = vmatprep.mubr.bf16.mxu0 %v3632_v15  ;;  %2131 = vmatprep.mubr.bf16.mxu1 %v3634_v16  ;;  %v3662_v13 = vld [vmem:[%s5132_s4 + $0x194] ss:$24 sps:$4 sm:$0xff]   ;;  %v3250_v15 = vpack.c.bf16 %v1613_v12, %v1613_v12  ;;  %v4396_v16 = vpop.permute.xlu1 %497 }
  0xb0   : > { %2760 = vrot.lane.b32.xlu1 %v3245_v50, %s3719_s12  ;;  %v3256_v50 = vpack.c.bf16 %v1619_v46, %v1619_v46  ;;  %v3700_v46 = vld [vmem:[%s5130_s2 + $0xe4] ss:$8 sps:$4 sm:$0xff]  }
  0xb1   : > { %2762 = vrot.lane.b32.xlu0 %v3246_v60, %s3719_s12 }
  0xb3   : > { %v4411_v22 = vpop.permute.xlu1 %507 }
  0xb4   : > { %2764 = vrot.lane.b32.xlu1 %v3247_v61, %s3719_s12  ;;  %v1622_v61 = vld [vmem:[%s5134_s6 + $0xd8] sm:$0xff] }
  0xb5   : > { %2766 = vrot.lane.b32.xlu0 %v3248_v5, %s3719_s12 }
  0xb6   : > { %1459 = vmatmul.mubr.bf16.gmra.mrb[12].mxu0 %v3636_v24  ;;  %2132 = vmatmul.mubr.bf16.gmra.mrb[76].mxu1 %v3637_v25  ;;  %v3668_v24 = vld [vmem:[%s5132_s4 + $0x1c4] ss:$24 sps:$4 sm:$0xff]  }
  0xb7   : > { %1466 = vmatprep.mubr.bf16.mxu0 %v3638_v28  ;;  %2139 = vmatprep.mubr.bf16.mxu1 %v3640_v29  ;;  %v3670_v25 = vld [vmem:[%s5130_s2 + $0x94] ss:$8 sps:$4 sm:$0xff]   ;;  %v4422_v28 = vpop.permute.xlu0 %512  ;;  %v1616_v29 = vld [vmem:[%s5134_s6 + $0xa8] sm:$0xff]  ;;  %v4428_v31 = vpop.permute.xlu1 %517 }
  0xb8   : > { %2768 = vrot.lane.b32.xlu1 %v3249_v7, %s3719_s12  ;;  %v3253_v30 = vpack.c.bf16 %v1616_v29, %v1616_v29  ;;  %v3260_v7 = vpack.c.bf16 %v1623_v2, %v1623_v2  ;;  %v3694_v29 = vld [vmem:[%s5130_s2 + $0xd4] ss:$8 sps:$4 sm:$0xff]  }
  0xb9   : > { %2770 = vrot.lane.b32.xlu0 %v3250_v15, %s3719_s12 }
  0xbb   : > { %v4437_v36 = vpop.permute.xlu0 %522 }
  0xbc   : > { %2772 = vrot.lane.b32.xlu1 %v3251_v18, %s3719_s12  ;;  %5136 = vst [vmem:[#allocation2_spill] sm:$0xff] %v4437_v36 }
  0xbd   : > { %2774 = vrot.lane.b32.xlu0 %v3252_v27, %s3719_s12  ;;  %v3692_v27 = vld [vmem:[%s5132_s4 + $0x284] ss:$24 sps:$4 sm:$0xff]  }
  0xbe   : > { %1467 = vmatmul.mubr.bf16.gmra.mrb[16].mxu0 %v3642_v39  ;;  %2140 = vmatmul.mubr.bf16.gmra.mrb[80].mxu1 %v3643_v40  ;;  %v3676_v39 = vld [vmem:[%s5130_s2 + $0xa4] ss:$8 sps:$4 sm:$0xff]   ;;  %v3254_v40 = vpack.c.bf16 %v1617_v37, %v1617_v37 }
  0xbf   : > { %1474 = vmatprep.mubr.bf16.mxu0 %v3644_v42  ;;  %2147 = vmatprep.mubr.bf16.mxu1 %v3646_v43  ;;  %v3255_v42 = vpack.c.bf16 %v1618_v41, %v1618_v41  ;;  %v4452_v43 = vpop.permute.xlu1 %527  ;;  %v4454_v45 = vpop.permute.xlu0 %532 }
  0xc0   : > { %2776 = vrot.lane.b32.xlu1 %v3253_v30, %s3719_s12  ;;  %5137 = vst [vmem:[#allocation3_spill] sm:$0xff] %v4452_v43  ;;  %5138 = vst [vmem:[#allocation4_spill] sm:$0xff] %v4454_v45 }
  0xc1   : > { %2778 = vrot.lane.b32.xlu0 %v3254_v40, %s3719_s12  ;;  %v3697_v40 = vld [vmem:[%s5130_s2 + $0xd0] ss:$8 sps:$4 sm:$0xff]  }
  0xc3   : > { %v4475_v55 = vpop.permute.xlu1 %537  ;;  %v4481_v60 = vpop.permute.xlu0 %542 }
  0xc4   : > { %2780 = vrot.lane.b32.xlu1 %v3255_v42, %s3719_s12  ;;  %5139 = vst [vmem:[#allocation5_spill] sm:$0xff] %v4475_v55  ;;  %5140 = vst [vmem:[#allocation6_spill] sm:$0xff] %v4481_v60  ;;  %v3698_v42 = vld [vmem:[%s5132_s4 + $0x2b4] ss:$24 sps:$4 sm:$0xff]  }
  0xc5   : > { %2782 = vrot.lane.b32.xlu0 %v3256_v50, %s3719_s12 }
  0xc6   : > { %1475 = vmatmul.mubr.bf16.gmra.mrb[20].mxu0 %v3648_v52  ;;  %2148 = vmatmul.mubr.bf16.gmra.mrb[84].mxu1 %v3649_v53  ;;  %v3682_v52 = vld [vmem:[%s5130_s2 + $0xb4] ss:$8 sps:$4 sm:$0xff]   ;;  %v1620_v53 = vld [vmem:[%s5134_s6 + $0xc8] sm:$0xff] }
  0xc7   : > { %1482 = vmatprep.mubr.bf16.mxu0 %v3650_v56  ;;  %2155 = vmatprep.mubr.bf16.mxu1 %v3652_v57  ;;  %v3257_v56 = vpack.c.bf16 %v1620_v53, %v1620_v53  ;;  %v1621_v57 = vld [vmem:[%s5134_s6 + $0xd0] sm:$0xff]  ;;  %v4499_v5 = vpop.permute.xlu1 %547 }
  0xc8   : > { %v3258_v59 = vpack.c.bf16 %v1621_v57, %v1621_v57  ;;  %5141 = vst [vmem:[#allocation7_spill] sm:$0xff] %v4499_v5  ;;  %v3702_v53 = vld [vmem:[%s5132_s4 + $0x2b0] ss:$24 sps:$4 sm:$0xff]  }
  0xc9   : > { %2784 = vrot.lane.b32.xlu1 %v3257_v56, %s3719_s12  ;;  %v3703_v56 = vld [vmem:[%s5130_s2 + $0xe0] ss:$8 sps:$4 sm:$0xff]  }
  0xca   : > { %2786 = vrot.lane.b32.xlu0 %v3258_v59, %s3719_s12 }
  0xcb   : > { %v4516_v18 = vpop.permute.xlu1 %557 }
  0xcc   : > { %5143 = vst [vmem:[#allocation9_spill] sm:$0xff] %v4516_v18 }
  0xce   : > { %1483 = vmatmul.mubr.bf16.gmra.mrb[24].mxu0 %v3654_v63  ;;  %2156 = vmatmul.mubr.bf16.gmra.mrb[88].mxu1 %v3655_v0  ;;  %v3259_v63 = vpack.c.bf16 %v1622_v61, %v1622_v61  ;;  %v3704_v61 = vld [vmem:[%s5132_s4 + $0x2e4] ss:$24 sps:$4 sm:$0xff]  }
  0xcf   : > { %1490 = vmatprep.mubr.bf16.mxu0 %v3656_v3  ;;  %2163 = vmatprep.mubr.bf16.mxu1 %v3658_v4  ;;  %v3684_v3 = vld [vmem:[%s5132_s4 + $0x220] ss:$24 sps:$4 sm:$0xff]  }
  0xd0   : > { %v3685_v4 = vld [vmem:[%s5130_s2 + $0xb0] ss:$8 sps:$4 sm:$0xff]   ;;  %2788 = vrot.lane.b32.xlu1 %v3259_v63, %s3719_s12  ;;  %2790 = vrot.lane.b32.xlu0 %v3260_v7, %s3719_s12  ;;  %v3706_v63 = vld [vmem:[%s5130_s2 + $0xf4] ss:$8 sps:$4 sm:$0xff]  }
  0xd6   : > { %1491 = vmatmul.mubr.bf16.gmra.mrb[28].mxu0 %v3660_v10  ;;  %2164 = vmatmul.mubr.bf16.gmra.mrb[92].mxu1 %v3661_v11  ;;  %v3686_v10 = vld [vmem:[%s5132_s4 + $0x254] ss:$24 sps:$4 sm:$0xff]  }
  0xd7   : > { %1498 = vmatprep.mubr.bf16.mxu0 %v3662_v13  ;;  %2171 = vmatprep.mubr.bf16.mxu1 %v3664_v14  ;;  %v3688_v11 = vld [vmem:[%s5130_s2 + $0xc4] ss:$8 sps:$4 sm:$0xff]   ;;  %v4512_v14 = vpop.permute.xlu0 %552 }
  0xd8   : > { %v1624_v13 = vld [vmem:[%s5134_s6 + $0xe8] sm:$0xff]  ;;  %5142 = vst [vmem:[#allocation8_spill] sm:$0xff] %v4512_v14 }
  0xd9   : > { %v3261_v17 = vpack.c.bf16 %v1624_v13, %v1624_v13 }
  0xdb   : > { %2792 = vrot.lane.b32.xlu1 %v3261_v17, %s3719_s12 }
  0xde   : > { %1499 = vmatmul.mubr.bf16.gmra.mrb[32].mxu0 %v3666_v20  ;;  %2172 = vmatmul.mubr.bf16.gmra.mrb[96].mxu1 %v3667_v21  ;;  %v3690_v21 = vld [vmem:[%s5132_s4 + $0x250] ss:$24 sps:$4 sm:$0xff]  }
  0xdf   : > { %1506 = vmatprep.mubr.bf16.mxu0 %v3668_v24  ;;  %2179 = vmatprep.mubr.bf16.mxu1 %v3670_v25  ;;  %v4527_v24 = vpop.permute.xlu0 %562 }
  0xe0   : > { %5144 = vst [vmem:[#allocation10_spill] sm:$0xff] %v4527_v24 }
  0xe3   : > { %v4539_v37 = vpop.permute.xlu0 %572 }
  0xe4   : > { %5146 = vst [vmem:[#allocation12_spill] sm:$0xff] %v4539_v37 }
  0xe6   : > { %1507 = vmatmul.mubr.bf16.gmra.mrb[36].mxu0 %v3672_v32  ;;  %2180 = vmatmul.mubr.bf16.gmra.mrb[100].mxu1 %v3673_v34  ;;  %v4537_v34 = vpop.permute.xlu1 %567 }
  0xe7   : > { %1514 = vmatprep.mubr.bf16.mxu0 %v3674_v38  ;;  %2187 = vmatprep.mubr.bf16.mxu1 %v3676_v39  ;;  %5145 = vst [vmem:[#allocation11_spill] sm:$0xff] %v4537_v34  ;;  %v3696_v39 = vld [vmem:[%s5132_s4 + $0x280] ss:$24 sps:$4 sm:$0xff]  }
  0xee   : > { %1515 = vmatmul.mubr.bf16.gmra.mrb[40].mxu0 %v3678_v47  ;;  %2188 = vmatmul.mubr.bf16.gmra.mrb[104].mxu1 %v3679_v49  ;;  %v4557_v49 = vpop.permute.xlu1 %577 }
  0xef   : > { %1522 = vmatprep.mubr.bf16.mxu0 %v3680_v51  ;;  %2195 = vmatprep.mubr.bf16.mxu1 %v3682_v52  ;;  %5147 = vst [vmem:[#allocation13_spill] sm:$0xff] %v4557_v49  ;;  %v4559_v51 = vpop.permute.xlu0 %582 }
  0xf0   : > { %5148 = vst [vmem:[#allocation14_spill] sm:$0xff] %v4559_v51 }
  0xf1   : > { %v4488_v0 = vpop.f32.mrb[0].mxu1 }
  0xf2   : > { %v1116_v6 = vpop.f32.mrb[1].mxu1  ;;  %v4569_v57 = vpop.permute.xlu1 %587 }
  0xf3   : > { %v4507_v12 = vpop.f32.mrb[2].mxu1  ;;  %5149 = vst [vmem:[#allocation15_spill] sm:$0xff] %v4569_v57 }
  0xf4   : > { %v1119_v15 = vpop.f32.mrb[3].mxu1 }
  0xf6   : > { %1523 = vmatmul.mubr.bf16.gmra.mrb[44].mxu0 %v3684_v3  ;;  %2196 = vmatmul.mubr.bf16.gmra.mrb[108].mxu1 %v3685_v4  ;;  %v4579_v3 = vpop.permute.xlu0 %592  ;;  %v4581_v6 = vpop.permute.xlu1 %597 }
  0xf7   : > { %1530 = vmatprep.mubr.bf16.mxu0 %v3686_v10  ;;  %2203 = vmatprep.mubr.bf16.mxu1 %v3688_v11  ;;  %5150 = vst [vmem:[#allocation16_spill] sm:$0xff] %v4579_v3  ;;  %5151 = vst [vmem:[#allocation17_spill] sm:$0xff] %v4581_v6  ;;  %v3708_v10 = vld [vmem:[%s5132_s4 + $0x2e0] ss:$24 sps:$4 sm:$0xff]  }
  0xf8   : > { %v3709_v11 = vld [vmem:[%s5130_s2 + $0xf0] ss:$8 sps:$4 sm:$0xff]  }
  0xf9   : > { %v4519_v20 = vpop.f32.mrb[4].mxu1 }
  0xfa   : > { %v1124_v25 = vpop.f32.mrb[5].mxu1  ;;  %v4591_v13 = vpop.permute.xlu0 %1757 }
  0xfb   : > { %v4535_v30 = vpop.f32.mrb[6].mxu1 }
  0xfc   : > { %v1127_v32 = vpop.f32.mrb[7].mxu1 }
  0xfe   : > { %1531 = vmatmul.mubr.bf16.gmra.mrb[48].mxu0 %v3690_v21  ;;  %2204 = vmatmul.mubr.bf16.gmra.mrb[112].mxu1 %v3691_v23  ;;  %v4595_v23 = vpop.permute.xlu1 %1762  ;;  %v4597_v25 = vpop.permute.xlu0 %1767 }
  0xff   : > { %1538 = vmatprep.mubr.bf16.mxu0 %v3692_v27  ;;  %2211 = vmatprep.mubr.bf16.mxu1 %v3694_v29 }
 0x101   : > { %v4541_v38 = vpop.f32.mrb[8].mxu1 }
 0x102   : > { %v1132_v41 = vpop.f32.mrb[9].mxu1 }
 0x103   : > { %v4555_v47 = vpop.f32.mrb[10].mxu1  ;;  %v4605_v41 = vpop.permute.xlu0 %1777 }
 0x104   : > { %v1135_v50 = vpop.f32.mrb[11].mxu1 }
 0x106   : > { %1539 = vmatmul.mubr.bf16.gmra.mrb[52].mxu0 %v3696_v39  ;;  %2212 = vmatmul.mubr.bf16.gmra.mrb[116].mxu1 %v3697_v40  ;;  %v4603_v39 = vpop.permute.xlu1 %1772 }
 0x107   : > { %1546 = vmatprep.mubr.bf16.mxu0 %v3698_v42  ;;  %2219 = vmatprep.mubr.bf16.mxu1 %v3700_v46 }
 0x109   : > { %v4561_v52 = vpop.f32.mrb[12].mxu1 }
 0x10a   : > { %v1140_v59 = vpop.f32.mrb[13].mxu1  ;;  %v4609_v46 = vpop.permute.xlu1 %1782 }
 0x10b   : > { %v4577_v2 = vpop.f32.mrb[14].mxu1 }
 0x10c   : > { %v1143_v4 = vpop.f32.mrb[15].mxu1 }
 0x10e   : > { %1547 = vmatmul.mubr.bf16.gmra.mrb[56].mxu0 %v3702_v53  ;;  %2220 = vmatmul.mubr.bf16.gmra.mrb[120].mxu1 %v3703_v56  ;;  %v4613_v56 = vpop.permute.xlu0 %1787 }
 0x10f   : > { %1554 = vmatprep.mubr.bf16.mxu0 %v3704_v61  ;;  %2227 = vmatprep.mubr.bf16.mxu1 %v3706_v63  ;;  %v4615_v61 = vpop.permute.xlu1 %1792 }
 0x111   : > { %v4583_v7 = vpop.f32.mrb[16].mxu1 }
 0x112   : > { %v1148_v15 = vpop.f32.mrb[17].mxu1  ;;  %v4619_v4 = vpop.permute.xlu0 %1797 }
 0x113   : > { %v4593_v17 = vpop.f32.mrb[18].mxu1 }
 0x114   : > { %v1151_v21 = vpop.f32.mrb[19].mxu1 }
 0x115   : > { %v4623_v21 = vpop.permute.xlu1 %1802 }
 0x116   : > { %1555 = vmatmul.mubr.bf16.gmra.mrb[60].mxu0 %v3708_v10  ;;  %2228 = vmatmul.mubr.bf16.gmra.mrb[124].mxu1 %v3709_v11 }
 0x119   : > { %v4599_v27 = vpop.f32.mrb[20].mxu1 }
 0x11a   : > { %v1156_v29 = vpop.f32.mrb[21].mxu1 }
 0x11b   : > { %v4601_v32 = vpop.f32.mrb[22].mxu1  ;;  %v4625_v29 = vpop.permute.xlu0 %1807 }
 0x11c   : > { %v1159_v40 = vpop.f32.mrb[23].mxu1 }
 0x11f   : > { %v4633_v57 = vpop.permute.xlu0 %1817 }
 0x121   : > { %v4607_v42 = vpop.f32.mrb[24].mxu1 }
 0x122   : > { %v1164_v50 = vpop.f32.mrb[25].mxu1 }
 0x123   : > { %v4611_v53 = vpop.f32.mrb[26].mxu1  ;;  %v4641_v37 = vpop.permute.xlu0 %1827 }
 0x124   : > { %v1167_v59 = vpop.f32.mrb[27].mxu1  ;;  %5156 = vst [vmem:[#allocation22_spill] sm:$0xff] %v4641_v37 }
 0x125   : > { %v4631_v59 = vpop.permute.xlu1 %1812 }
 0x127   : > { %v4647_v18 = vpop.permute.xlu0 %1837 }
 0x128   : > { %5159 = vst [vmem:[#allocation25_spill] sm:$0xff] %v4647_v18 }
 0x129   : > { %v4617_v63 = vpop.f32.mrb[28].mxu1 }
 0x12a   : > { %v1172_v10 = vpop.f32.mrb[29].mxu1 }
 0x12b   : > { %v4621_v11 = vpop.f32.mrb[30].mxu1  ;;  %v4637_v10 = vpop.permute.xlu1 %1822 }
 0x12c   : > { %v1175_v15 = vpop.f32.mrb[31].mxu1  ;;  %v4653_v55 = vpop.permute.xlu0 %1847 }
 0x12d   : > { %5162 = vst [vmem:[#allocation28_spill] sm:$0xff] %v4653_v55 }
 0x12f   : > { %v4643_v24 = vpop.permute.xlu1 %1832 }
 0x130   : > { %5157 = vst [vmem:[#allocation23_spill] sm:$0xff] %v4643_v24 }
 0x131   : > { %v4627_v40 = vpop.f32.mrb[32].mxu1 }
 0x132   : > { %5152 = vst [vmem:[#allocation18_spill] sm:$0xff] %v4627_v40  ;;  %v1180_v50 = vpop.f32.mrb[33].mxu1 }
 0x133   : > { %v4629_v6 = vpop.f32.mrb[34].mxu1  ;;  %v4651_v60 = vpop.permute.xlu1 %1842 }
 0x134   : > { %5153 = vst [vmem:[#allocation19_spill] sm:$0xff] %v4629_v6  ;;  %v1183_v3 = vpop.f32.mrb[35].mxu1  ;;  %5161 = vst [vmem:[#allocation27_spill] sm:$0xff] %v4651_v60  ;;  %v4661_v6 = vpop.permute.xlu0 %1857 }
 0x135   : > { %5166 = vst [vmem:[#allocation32_spill] sm:$0xff] %v4661_v6 }
 0x138   : > { %v4669_v60 = vpop.permute.xlu0 %1867 }
 0x139   : > { %v4635_v51 = vpop.f32.mrb[36].mxu1  ;;  %5170 = vst [vmem:[#allocation36_spill] sm:$0xff] %v4669_v60 }
 0x13a   : > { %5154 = vst [vmem:[#allocation20_spill] sm:$0xff] %v4635_v51  ;;  %v1188_v49 = vpop.f32.mrb[37].mxu1 }
 0x13b   : > { %v4639_v15 = vpop.f32.mrb[38].mxu1 }
 0x13c   : > { %5155 = vst [vmem:[#allocation21_spill] sm:$0xff] %v4639_v15  ;;  %v1191_v34 = vpop.f32.mrb[39].mxu1 }
 0x13d   : > { %v4659_v34 = vpop.permute.xlu1 %1852 }
 0x13e   : > { %5165 = vst [vmem:[#allocation31_spill] sm:$0xff] %v4659_v34 }
 0x141   : > { %v4645_v50 = vpop.f32.mrb[40].mxu1 }
 0x142   : > { %5158 = vst [vmem:[#allocation24_spill] sm:$0xff] %v4645_v50  ;;  %v1196_v14 = vpop.f32.mrb[41].mxu1 }
 0x143   : > { %v4649_v3 = vpop.f32.mrb[42].mxu1  ;;  %v4665_v14 = vpop.permute.xlu1 %1862 }
 0x144   : > { %5160 = vst [vmem:[#allocation26_spill] sm:$0xff] %v4649_v3  ;;  %v1199_v5 = vpop.f32.mrb[43].mxu1  ;;  %5168 = vst [vmem:[#allocation34_spill] sm:$0xff] %v4665_v14 }
 0x147   : > { %v4671_v18 = vpop.permute.xlu1 %1872 }
 0x148   : > { %5171 = vst [vmem:[#allocation37_spill] sm:$0xff] %v4671_v18 }
 0x149   : > { %v4655_v49 = vpop.f32.mrb[44].mxu1 }
 0x14a   : > { %5163 = vst [vmem:[#allocation29_spill] sm:$0xff] %v4655_v49  ;;  %v1204_v15 = vpop.f32.mrb[45].mxu1 }
 0x14b   : > { %v4657_v51 = vpop.f32.mrb[46].mxu1  ;;  %v4679_v34 = vpop.permute.xlu1 %1882 }
 0x14c   : > { %5164 = vst [vmem:[#allocation30_spill] sm:$0xff] %v4657_v51  ;;  %v1207_v45 = vpop.f32.mrb[47].mxu1  ;;  %v4675_v51 = vpop.permute.xlu0 %1877  ;;  %5175 = vst [vmem:[#allocation41_spill] sm:$0xff] %v4679_v34 }
 0x14d   : > { %5173 = vst [vmem:[#allocation39_spill] sm:$0xff] %v4675_v51 }
 0x151   : > { %v4663_v50 = vpop.f32.mrb[48].mxu1 }
 0x152   : > { %5167 = vst [vmem:[#allocation33_spill] sm:$0xff] %v4663_v50  ;;  %v1212_v3 = vpop.f32.mrb[49].mxu1  ;;  %v4681_v50 = vpop.permute.xlu0 %1887 }
 0x153   : > { %v4667_v5 = vpop.f32.mrb[50].mxu1  ;;  %5176 = vst [vmem:[#allocation42_spill] sm:$0xff] %v4681_v50 }
 0x154   : > { %5169 = vst [vmem:[#allocation35_spill] sm:$0xff] %v4667_v5  ;;  %v1215_v55 = vpop.f32.mrb[51].mxu1 }
 0x155   : > { %v4687_v55 = vpop.permute.xlu1 %1892 }
 0x156   : > { %5179 = vst [vmem:[#allocation45_spill] sm:$0xff] %v4687_v55  ;;  %v4689_v60 = vpop.permute.xlu0 %1897 }
 0x157   : > { %5180 = vst [vmem:[#allocation46_spill] sm:$0xff] %v4689_v60 }
 0x159   : > { %v4673_v15 = vpop.f32.mrb[52].mxu1 }
 0x15a   : > { %5172 = vst [vmem:[#allocation38_spill] sm:$0xff] %v4673_v15  ;;  %v1220_v49 = vpop.f32.mrb[53].mxu1  ;;  %v4697_v34 = vpop.permute.xlu0 %1907 }
 0x15b   : > { %v4677_v45 = vpop.f32.mrb[54].mxu1  ;;  %v4693_v49 = vpop.permute.xlu1 %1902  ;;  %5184 = vst [vmem:[#allocation50_spill] sm:$0xff] %v4697_v34 }
 0x15c   : > { %5174 = vst [vmem:[#allocation40_spill] sm:$0xff] %v4677_v45  ;;  %v1223_v6 = vpop.f32.mrb[55].mxu1  ;;  %5182 = vst [vmem:[#allocation48_spill] sm:$0xff] %v4693_v49 }
 0x161   : > { %v4683_v3 = vpop.f32.mrb[56].mxu1 }
 0x162   : > { %5177 = vst [vmem:[#allocation43_spill] sm:$0xff] %v4683_v3  ;;  %v1228_v5 = vpop.f32.mrb[57].mxu1  ;;  %v4703_v3 = vpop.permute.xlu0 %2734 }
 0x163   : > { %v4685_v14 = vpop.f32.mrb[58].mxu1  ;;  %v1115_v5 = vadd.f32 %v4488_v0, %v4270_v26  ;;  %5186 = vst [vmem:[#allocation52_spill] sm:$0xff] %v4703_v3 }
 0x164   : > { %5178 = vst [vmem:[#allocation44_spill] sm:$0xff] %v4685_v14  ;;  %v1231_v18 = vpop.f32.mrb[59].mxu1  ;;  %v4701_v14 = vpop.permute.xlu1 %1912 }
 0x165   : > { %5185 = vst [vmem:[#allocation51_spill] sm:$0xff] %v4701_v14 }
 0x169   : > { %v4691_v15 = vpop.f32.mrb[60].mxu1 }
 0x16a   : > { %5181 = vst [vmem:[#allocation47_spill] sm:$0xff] %v4691_v15  ;;  %v1236_v45 = vpop.f32.mrb[61].mxu1  ;;  %v1118_v15 = vadd.f32 %v4507_v12, %v4291_v35  ;;  %v1123_v35 = vadd.f32 %v4519_v20, %v4286_v33  ;;  %v4718_v12 = vpop.permute.xlu1 %2736 }
 0x16b   : > { %v4695_v6 = vpop.f32.mrb[62].mxu1 }
 0x16c   : > { %5183 = vst [vmem:[#allocation49_spill] sm:$0xff] %v4695_v6  ;;  %v1239_v50 = vpop.f32.mrb[63].mxu1 }
 0x171   : > { %v1436_v18 = vpop.f32.mrb[0].mxu0  ;;  %v3280_v60 = vpop.f32.mrb[64].mxu1 }
 0x172   : > { %v3377_v49 = vadd.f32 %v1436_v18, %v1115_v5  ;;  %v1438_v45 = vpop.f32.mrb[1].mxu0  ;;  %v3281_v55 = vpop.f32.mrb[65].mxu1 }
 0x173   : > { %v3282_v6 = vadd.f32 %v3281_v55, %v3280_v60  ;;  %v1439_v51 = vpop.f32.mrb[2].mxu0  ;;  %v3283_v34 = vpop.f32.mrb[66].mxu1 }
 0x174   : > { %v1563_v50 = vmax.f32 %v3377_v49, 0.0  ;;  %v3379_v43 = vadd.f32 %v1439_v51, %v1118_v15  ;;  %v1441_v40 = vpop.f32.mrb[3].mxu0  ;;  %v3284_v26 = vpop.f32.mrb[67].mxu1 }
 0x175   : > { %v2110_v0 = vadd.f32 %v3282_v6, %v4591_v13  ;;  %v3285_v14 = vadd.f32 %v3284_v26, %v3283_v34  ;;  %v4720_v51 = vpop.permute.xlu0 %2738  ;;  %v1126_v34 = vadd.f32 %v4535_v30, %v4313_v44  ;;  %v1131_v26 = vadd.f32 %v4541_v38, %v4320_v48 }
 0x176   : > { %v3200_v3 = vpack.c.bf16 %v1563_v50, %v1563_v50  ;;  %v1564_v36 = vmax.f32 %v3379_v43, 0.0 }
 0x177   : > { %v2236_v24 = vmax.f32 %v2110_v0, 0.0  ;;  %v2113_v37 = vadd.f32 %v3285_v14, %v4595_v23 }
 0x178   : > { %v3201_v60 = vpack.c.bf16 %v1564_v36, %v1564_v36  ;;  %2525 = vrot.lane.b32.xlu0 %v3200_v3, %s3720_s8 }
 0x179   : > { %v3168_v43 = vpack.c.bf16 %v2236_v24, %v2236_v24  ;;  %v2237_v13 = vmax.f32 %v2113_v37, 0.0  ;;  %v1444_v23 = vpop.f32.mrb[4].mxu0  ;;  %v3286_v40 = vpop.f32.mrb[68].mxu1 }
 0x17a   : > { %v3381_v14 = vadd.f32 %v1444_v23, %v1123_v35  ;;  %v1446_v33 = vpop.f32.mrb[5].mxu0  ;;  %2527 = vrot.lane.b32.xlu1 %v3201_v60, %s3720_s8  ;;  %v3287_v36 = vpop.f32.mrb[69].mxu1 }
 0x17b   : > { %v3169_v20 = vpack.c.bf16 %v2237_v13, %v2237_v13  ;;  %v3288_v15 = vadd.f32 %v3287_v36, %v3286_v40  ;;  %v1447_v3 = vpop.f32.mrb[6].mxu0  ;;  %v3289_v55 = vpop.f32.mrb[70].mxu1  ;;  %2397 = vst.msk [vmem:[%s4713_s30] sm:$0xf] %vm2396_vm0, %v3168_v43  ;;  %v1134_v40 = vadd.f32 %v4555_v47, %v4333_v54 }
 0x17c   : > { %v1565_v49 = vmax.f32 %v3381_v14, 0.0  ;;  %v3383_v24 = vadd.f32 %v1447_v3, %v1126_v34  ;;  %v1449_v37 = vpop.f32.mrb[7].mxu0  ;;  %v3290_v6 = vpop.f32.mrb[71].mxu1 }
 0x17d   : > { %v2118_v5 = vadd.f32 %v3288_v15, %v4597_v25  ;;  %v3291_v18 = vadd.f32 %v3290_v6, %v3289_v55  ;;  %2398 = vst.msk [vmem:[%s4713_s30 + $0x4] sm:$0xf] %vm2396_vm0, %v3169_v20  ;;  %v4734_v35 = vpop.permute.xlu1 %2740  ;;  %v4736_v60 = vpop.permute.xlu0 %2742 }
 0x17e   : > { %v3202_v44 = vpack.c.bf16 %v1565_v49, %v1565_v49  ;;  %v1566_v30 = vmax.f32 %v3383_v24, 0.0 }
 0x17f   : > { %v2238_v45 = vmax.f32 %v2118_v5, 0.0  ;;  %v2121_v50 = vadd.f32 %v3291_v18, %v4603_v39  ;;  %v1139_v5 = vadd.f32 %v4561_v52, %v4344_v58 }
 0x180   : > { %v3203_v0 = vpack.c.bf16 %v1566_v30, %v1566_v30  ;;  %2529 = vrot.lane.b32.xlu0 %v3202_v44, %s3720_s8 }
 0x181   : > { %v3170_v25 = vpack.c.bf16 %v2238_v45, %v2238_v45  ;;  %v2239_v43 = vmax.f32 %v2121_v50, 0.0  ;;  %v1452_v13 = vpop.f32.mrb[8].mxu0  ;;  %v3292_v23 = vpop.f32.mrb[72].mxu1 }
 0x182   : > { %v3385_v39 = vadd.f32 %v1452_v13, %v1131_v26  ;;  %v1454_v34 = vpop.f32.mrb[9].mxu0  ;;  %2531 = vrot.lane.b32.xlu1 %v3203_v0, %s3720_s8  ;;  %v3293_v48 = vpop.f32.mrb[73].mxu1  ;;  %v1142_v0 = vadd.f32 %v4577_v2, %v4351_v62 }
 0x183   : > { %v3171_v38 = vpack.c.bf16 %v2239_v43, %v2239_v43  ;;  %v3294_v14 = vadd.f32 %v3293_v48, %v3292_v23  ;;  %v1455_v33 = vpop.f32.mrb[10].mxu0  ;;  %v3295_v36 = vpop.f32.mrb[74].mxu1  ;;  %2399 = vst.msk [vmem:[%s4713_s30 + $0x8] sm:$0xf] %vm2396_vm0, %v3170_v25 }
 0x184   : > { %v1567_v20 = vmax.f32 %v3385_v39, 0.0  ;;  %v3387_v15 = vadd.f32 %v1455_v33, %v1134_v40  ;;  %v1457_v3 = vpop.f32.mrb[11].mxu0  ;;  %v3296_v55 = vpop.f32.mrb[75].mxu1 }
 0x185   : > { %v2126_v49 = vadd.f32 %v3294_v14, %v4605_v41  ;;  %v3297_v24 = vadd.f32 %v3296_v55, %v3295_v36  ;;  %2400 = vst.msk [vmem:[%s4713_s30 + $0xc] sm:$0xf] %vm2396_vm0, %v3171_v38  ;;  %v4750_v44 = vpop.permute.xlu1 %2744  ;;  %v4752_v30 = vpop.permute.xlu0 %2746 }
 0x186   : > { %v3204_v54 = vpack.c.bf16 %v1567_v20, %v1567_v20  ;;  %v1568_v47 = vmax.f32 %v3387_v15, 0.0  ;;  %v1147_v20 = vadd.f32 %v4583_v7, %v4361_v1 }
 0x187   : > { %v2240_v37 = vmax.f32 %v2126_v49, 0.0  ;;  %v2129_v6 = vadd.f32 %v3297_v24, %v4609_v46 }
 0x188   : > { %v3205_v18 = vpack.c.bf16 %v1568_v47, %v1568_v47  ;;  %2533 = vrot.lane.b32.xlu0 %v3204_v54, %s3720_s8  ;;  %v1150_v47 = vadd.f32 %v4593_v17, %v4376_v8 }
 0x189   : > { %v3172_v41 = vpack.c.bf16 %v2240_v37, %v2240_v37  ;;  %v2241_v45 = vmax.f32 %v2129_v6, 0.0  ;;  %v1460_v50 = vpop.f32.mrb[12].mxu0  ;;  %v3298_v26 = vpop.f32.mrb[76].mxu1 }
 0x18a   : > { %v3389_v46 = vadd.f32 %v1460_v50, %v1139_v5  ;;  %v1462_v25 = vpop.f32.mrb[13].mxu0  ;;  %2535 = vrot.lane.b32.xlu1 %v3205_v18, %s3720_s8  ;;  %v3299_v58 = vpop.f32.mrb[77].mxu1 }
 0x18b   : > { %v3173_v52 = vpack.c.bf16 %v2241_v45, %v2241_v45  ;;  %v3300_v43 = vadd.f32 %v3299_v58, %v3298_v26  ;;  %v1463_v13 = vpop.f32.mrb[14].mxu0  ;;  %v3301_v23 = vpop.f32.mrb[78].mxu1  ;;  %2401 = vst.msk [vmem:[%s4713_s30 + $0x10] sm:$0xf] %vm2396_vm0, %v3172_v41 }
 0x18c   : > { %v1569_v40 = vmax.f32 %v3389_v46, 0.0  ;;  %v3391_v39 = vadd.f32 %v1463_v13, %v1142_v0  ;;  %v1465_v34 = vpop.f32.mrb[15].mxu0  ;;  %v3302_v48 = vpop.f32.mrb[79].mxu1 }
 0x18d   : > { %v2134_v38 = vadd.f32 %v3300_v43, %v4613_v56  ;;  %v3303_v14 = vadd.f32 %v3302_v48, %v3301_v23  ;;  %2402 = vst.msk [vmem:[%s4713_s30 + $0x14] sm:$0xf] %vm2396_vm0, %v3173_v52  ;;  %v4766_v3 = vpop.permute.xlu1 %2748  ;;  %v4768_v55 = vpop.permute.xlu0 %2750  ;;  %v1155_v52 = vadd.f32 %v4599_v27, %v4378_v9  ;;  %v1158_v48 = vadd.f32 %v4601_v32, %v4396_v16 }
 0x18e   : > { %v3206_v62 = vpack.c.bf16 %v1569_v40, %v1569_v40  ;;  %v1570_v2 = vmax.f32 %v3391_v39, 0.0 }
 0x18f   : > { %v2242_v33 = vmax.f32 %v2134_v38, 0.0  ;;  %v2137_v36 = vadd.f32 %v3303_v14, %v4615_v61 }
 0x190   : > { %v3207_v15 = vpack.c.bf16 %v1570_v2, %v1570_v2  ;;  %2537 = vrot.lane.b32.xlu0 %v3206_v62, %s3720_s8 }
 0x191   : > { %v3174_v56 = vpack.c.bf16 %v2242_v33, %v2242_v33  ;;  %v2243_v49 = vmax.f32 %v2137_v36, 0.0  ;;  %v1468_v24 = vpop.f32.mrb[16].mxu0  ;;  %v3304_v54 = vpop.f32.mrb[80].mxu1 }
 0x192   : > { %v3393_v61 = vadd.f32 %v1468_v24, %v1147_v20  ;;  %v1470_v37 = vpop.f32.mrb[17].mxu0  ;;  %2539 = vrot.lane.b32.xlu1 %v3207_v15, %s3720_s8  ;;  %v3305_v1 = vpop.f32.mrb[81].mxu1 }
 0x193   : > { %v3175_v7 = vpack.c.bf16 %v2243_v49, %v2243_v49  ;;  %v3306_v6 = vadd.f32 %v3305_v1, %v3304_v54  ;;  %v1471_v5 = vpop.f32.mrb[18].mxu0  ;;  %v3307_v18 = vpop.f32.mrb[82].mxu1  ;;  %2403 = vst.msk [vmem:[%s4713_s30 + $0x18] sm:$0xf] %vm2396_vm0, %v3174_v56 }
 0x194   : > { %v1571_v41 = vmax.f32 %v3393_v61, 0.0  ;;  %v3395_v45 = vadd.f32 %v1471_v5, %v1150_v47  ;;  %v1473_v50 = vpop.f32.mrb[19].mxu0  ;;  %v3308_v26 = vpop.f32.mrb[83].mxu1  ;;  %v1163_v47 = vadd.f32 %v4607_v42, %v4402_v19 }
 0x195   : > { %v2142_v0 = vadd.f32 %v3306_v6, %v4619_v4  ;;  %v3309_v46 = vadd.f32 %v3308_v26, %v3307_v18  ;;  %2404 = vst.msk [vmem:[%s4713_s30 + $0x1c] sm:$0xf] %vm2396_vm0, %v3175_v7  ;;  %v4782_v13 = vpop.permute.xlu1 %2752  ;;  %v4784_v23 = vpop.permute.xlu0 %2754  ;;  %v1166_v18 = vadd.f32 %v4611_v53, %v4411_v22 }
 0x196   : > { %v3208_v8 = vpack.c.bf16 %v1571_v41, %v1571_v41  ;;  %v1572_v17 = vmax.f32 %v3395_v45, 0.0 }
 0x197   : > { %v2244_v25 = vmax.f32 %v2142_v0, 0.0  ;;  %v2145_v58 = vadd.f32 %v3309_v46, %v4623_v21 }
 0x198   : > { %v3209_v43 = vpack.c.bf16 %v1572_v17, %v1572_v17  ;;  %2541 = vrot.lane.b32.xlu0 %v3208_v8, %s3720_s8 }
 0x199   : > { %v3176_v4 = vpack.c.bf16 %v2244_v25, %v2244_v25  ;;  %v2245_v40 = vmax.f32 %v2145_v58, 0.0  ;;  %v1476_v39 = vpop.f32.mrb[20].mxu0  ;;  %v3310_v34 = vpop.f32.mrb[84].mxu1 }
 0x19a   : > { %v3397_v21 = vadd.f32 %v1476_v39, %v1155_v52  ;;  %v1478_v38 = vpop.f32.mrb[21].mxu0  ;;  %2543 = vrot.lane.b32.xlu1 %v3209_v43, %s3720_s8  ;;  %v3311_v9 = vpop.f32.mrb[85].mxu1 }
 0x19b   : > { %v3177_v27 = vpack.c.bf16 %v2245_v40, %v2245_v40  ;;  %v3312_v14 = vadd.f32 %v3311_v9, %v3310_v34  ;;  %v1479_v62 = vpop.f32.mrb[22].mxu0  ;;  %v3313_v2 = vpop.f32.mrb[86].mxu1  ;;  %2405 = vst.msk [vmem:[%s4713_s30 + $0x20] sm:$0xf] %vm2396_vm0, %v3176_v4  ;;  %v1171_v4 = vadd.f32 %v4617_v63, %v4422_v28  ;;  %v1174_v9 = vadd.f32 %v4621_v11, %v4428_v31 }
 0x19c   : > { %v1573_v33 = vmax.f32 %v3397_v21, 0.0  ;;  %v3399_v36 = vadd.f32 %v1479_v62, %v1158_v48  ;;  %v1481_v20 = vpop.f32.mrb[23].mxu0  ;;  %v3314_v15 = vpop.f32.mrb[87].mxu1 }
 0x19d   : > { %v2150_v56 = vadd.f32 %v3312_v14, %v4625_v29  ;;  %v3315_v49 = vadd.f32 %v3314_v15, %v3313_v2  ;;  %2406 = vst.msk [vmem:[%s4713_s30 + $0x24] sm:$0xf] %vm2396_vm0, %v3177_v27  ;;  %v4798_v37 = vpop.permute.xlu1 %2756  ;;  %v4800_v1 = vpop.permute.xlu0 %2758 }
 0x19e   : > { %v3210_v16 = vpack.c.bf16 %v1573_v33, %v1573_v33  ;;  %v1574_v32 = vmax.f32 %v3399_v36, 0.0 }
 0x19f   : > { %v2246_v24 = vmax.f32 %v2150_v56, 0.0  ;;  %v2153_v54 = vadd.f32 %v3315_v49, %v4631_v59  ;;  %v5187_v56 = vld [vmem:[#allocation22_spill] sm:$0xff] }
 0x1a0   : > { %v3211_v61 = vpack.c.bf16 %v1574_v32, %v1574_v32  ;;  %2545 = vrot.lane.b32.xlu0 %v3210_v16, %s3720_s8 }
 0x1a1   : > { %v3178_v29 = vpack.c.bf16 %v2246_v24, %v2246_v24  ;;  %v2247_v7 = vmax.f32 %v2153_v54, 0.0  ;;  %v1484_v6 = vpop.f32.mrb[24].mxu0  ;;  %v3316_v5 = vpop.f32.mrb[88].mxu1  ;;  %v5188_v24 = vld [vmem:[#allocation23_spill] sm:$0xff] }
 0x1a2   : > { %v3401_v59 = vadd.f32 %v1484_v6, %v1163_v47  ;;  %v1486_v41 = vpop.f32.mrb[25].mxu0  ;;  %2547 = vrot.lane.b32.xlu1 %v3211_v61, %s3720_s8  ;;  %v3317_v19 = vpop.f32.mrb[89].mxu1  ;;  %v5189_v47 = vld [vmem:[#allocation2_spill] sm:$0xff] }
 0x1a3   : > { %v3179_v42 = vpack.c.bf16 %v2247_v7, %v2247_v7  ;;  %v3318_v45 = vadd.f32 %v3317_v19, %v3316_v5  ;;  %v1487_v50 = vpop.f32.mrb[26].mxu0  ;;  %v3319_v26 = vpop.f32.mrb[90].mxu1  ;;  %2407 = vst.msk [vmem:[%s4713_s30 + $0x28] sm:$0xf] %vm2396_vm0, %v3178_v29  ;;  %v5190_v61 = vld [vmem:[#allocation18_spill] sm:$0xff] }
 0x1a4   : > { %v1575_v0 = vmax.f32 %v3401_v59, 0.0  ;;  %v3403_v46 = vadd.f32 %v1487_v50, %v1166_v18  ;;  %v1489_v8 = vpop.f32.mrb[27].mxu0  ;;  %v3320_v17 = vpop.f32.mrb[91].mxu1  ;;  %v1179_v29 = vadd.f32 %v5190_v61, %v5189_v47 }
 0x1a5   : > { %v2158_v25 = vadd.f32 %v3318_v45, %v4633_v57  ;;  %v3321_v58 = vadd.f32 %v3320_v17, %v3319_v26  ;;  %2408 = vst.msk [vmem:[%s4713_s30 + $0x2c] sm:$0xf] %vm2396_vm0, %v3179_v42  ;;  %v4814_v39 = vpop.permute.xlu1 %2760  ;;  %v4816_v34 = vpop.permute.xlu0 %2762  ;;  %v5191_v42 = vld [vmem:[#allocation3_spill] sm:$0xff] }
 0x1a6   : > { %v3212_v22 = vpack.c.bf16 %v1575_v0, %v1575_v0  ;;  %v1576_v53 = vmax.f32 %v3403_v46, 0.0  ;;  %v5192_v45 = vld [vmem:[#allocation19_spill] sm:$0xff] }
 0x1a7   : > { %v2248_v52 = vmax.f32 %v2158_v25, 0.0  ;;  %v2161_v43 = vadd.f32 %v3321_v58, %v4637_v10  ;;  %v1182_v50 = vadd.f32 %v5192_v45, %v5191_v42 }
 0x1a8   : > { %v3213_v40 = vpack.c.bf16 %v1576_v53, %v1576_v53  ;;  %2549 = vrot.lane.b32.xlu0 %v3212_v22, %s3720_s8 }
 0x1a9   : > { %v3180_v57 = vpack.c.bf16 %v2248_v52, %v2248_v52  ;;  %v2249_v48 = vmax.f32 %v2161_v43, 0.0  ;;  %v1492_v21 = vpop.f32.mrb[28].mxu0  ;;  %v3322_v38 = vpop.f32.mrb[92].mxu1 }
 0x1aa   : > { %v3405_v10 = vadd.f32 %v1492_v21, %v1171_v4  ;;  %v1494_v27 = vpop.f32.mrb[29].mxu0  ;;  %2551 = vrot.lane.b32.xlu1 %v3213_v40, %s3720_s8  ;;  %v3323_v28 = vpop.f32.mrb[93].mxu1  ;;  %v5193_v4 = vld [vmem:[#allocation25_spill] sm:$0xff] }
 0x1ab   : > { %v3181_v63 = vpack.c.bf16 %v2249_v48, %v2249_v48  ;;  %v3324_v14 = vadd.f32 %v3323_v28, %v3322_v38  ;;  %v1495_v62 = vpop.f32.mrb[30].mxu0  ;;  %v3325_v2 = vpop.f32.mrb[94].mxu1  ;;  %2409 = vst.msk [vmem:[%s4713_s30 + $0x30] sm:$0xf] %vm2396_vm0, %v3180_v57  ;;  %v5195_v27 = vld [vmem:[#allocation4_spill] sm:$0xff] }
 0x1ac   : > { %v1577_v33 = vmax.f32 %v3405_v10, 0.0  ;;  %v3407_v36 = vadd.f32 %v1495_v62, %v1174_v9  ;;  %v1497_v20 = vpop.f32.mrb[31].mxu0  ;;  %v3326_v15 = vpop.f32.mrb[95].mxu1  ;;  %v5194_v9 = vld [vmem:[#allocation27_spill] sm:$0xff]  ;;  %v5196_v28 = vld [vmem:[#allocation20_spill] sm:$0xff] }
 0x1ad   : > { %v2166_v49 = vadd.f32 %v3324_v14, %v5187_v56  ;;  %v3327_v16 = vadd.f32 %v3326_v15, %v3325_v2  ;;  %2410 = vst.msk [vmem:[%s4713_s30 + $0x34] sm:$0xf] %vm2396_vm0, %v3181_v63  ;;  %v4830_v6 = vpop.permute.xlu1 %2764  ;;  %v4832_v5 = vpop.permute.xlu0 %2766  ;;  %v1187_v63 = vadd.f32 %v5196_v28, %v5195_v27  ;;  %v5197_v56 = vld [vmem:[#allocation5_spill] sm:$0xff] }
 0x1ae   : > { %v3214_v31 = vpack.c.bf16 %v1577_v33, %v1577_v33  ;;  %v1578_v11 = vmax.f32 %v3407_v36, 0.0 }
 0x1af   : > { %v2250_v32 = vmax.f32 %v2166_v49, 0.0  ;;  %v2169_v54 = vadd.f32 %v3327_v16, %v5188_v24  ;;  %v5198_v49 = vld [vmem:[#allocation21_spill] sm:$0xff] }
 0x1b0   : > { %v3215_v7 = vpack.c.bf16 %v1578_v11, %v1578_v11  ;;  %2553 = vrot.lane.b32.xlu0 %v3214_v31, %s3720_s8  ;;  %v1190_v16 = vadd.f32 %v5198_v49, %v5197_v56  ;;  %v5205_v56 = vld [vmem:[#allocation32_spill] sm:$0xff] }
 0x1b1   : > { %v3182_v18 = vpack.c.bf16 %v2250_v32, %v2250_v32  ;;  %v2251_v59 = vmax.f32 %v2169_v54, 0.0  ;;  %v1500_v41 = vpop.f32.mrb[32].mxu0  ;;  %v3328_v19 = vpop.f32.mrb[96].mxu1 }
 0x1b2   : > { %v3409_v26 = vadd.f32 %v1500_v41, %v1179_v29  ;;  %v1502_v0 = vpop.f32.mrb[33].mxu0  ;;  %2555 = vrot.lane.b32.xlu1 %v3215_v7, %s3720_s8  ;;  %v3329_v46 = vpop.f32.mrb[97].mxu1  ;;  %v5199_v41 = vld [vmem:[#allocation28_spill] sm:$0xff] }
 0x1b3   : > { %v3183_v8 = vpack.c.bf16 %v2251_v59, %v2251_v59  ;;  %v3330_v17 = vadd.f32 %v3329_v46, %v3328_v19  ;;  %v1503_v25 = vpop.f32.mrb[34].mxu0  ;;  %v3331_v58 = vpop.f32.mrb[98].mxu1  ;;  %2411 = vst.msk [vmem:[%s4713_s30 + $0x38] sm:$0xf] %vm2396_vm0, %v3182_v18  ;;  %v5200_v0 = vld [vmem:[#allocation31_spill] sm:$0xff] }
 0x1b4   : > { %v1579_v22 = vmax.f32 %v3409_v26, 0.0  ;;  %v3411_v53 = vadd.f32 %v1503_v25, %v1182_v50  ;;  %v1505_v52 = vpop.f32.mrb[35].mxu0  ;;  %v3332_v43 = vpop.f32.mrb[99].mxu1 }
 0x1b5   : > { %v2174_v40 = vadd.f32 %v3330_v17, %v5193_v4  ;;  %v3333_v57 = vadd.f32 %v3332_v43, %v3331_v58  ;;  %2412 = vst.msk [vmem:[%s4713_s30 + $0x3c] sm:$0xf] %vm2396_vm0, %v3183_v8  ;;  %v4846_v62 = vpop.permute.xlu1 %2768  ;;  %v4848_v2 = vpop.permute.xlu0 %2770  ;;  %v5201_v8 = vld [vmem:[#allocation6_spill] sm:$0xff]  ;;  %v5202_v17 = vld [vmem:[#allocation24_spill] sm:$0xff] }
 0x1b6   : > { %v3216_v48 = vpack.c.bf16 %v1579_v22, %v1579_v22  ;;  %v1580_v21 = vmax.f32 %v3411_v53, 0.0  ;;  %v1195_v25 = vadd.f32 %v5202_v17, %v5201_v8 }
 0x1b7   : > { %v2252_v38 = vmax.f32 %v2174_v40, 0.0  ;;  %v2177_v10 = vadd.f32 %v3333_v57, %v5194_v9  ;;  %v5203_v57 = vld [vmem:[#allocation7_spill] sm:$0xff] }
 0x1b8   : > { %v3217_v14 = vpack.c.bf16 %v1580_v21, %v1580_v21  ;;  %2557 = vrot.lane.b32.xlu0 %v3216_v48, %s3720_s8  ;;  %v5204_v48 = vld [vmem:[#allocation26_spill] sm:$0xff] }
 0x1b9   : > { %v3184_v33 = vpack.c.bf16 %v2252_v38, %v2252_v38  ;;  %v2253_v36 = vmax.f32 %v2177_v10, 0.0  ;;  %v1508_v20 = vpop.f32.mrb[36].mxu0  ;;  %v3334_v15 = vpop.f32.mrb[100].mxu1  ;;  %v1198_v21 = vadd.f32 %v5204_v48, %v5203_v57 }
 0x1ba   : > { %v3413_v31 = vadd.f32 %v1508_v20, %v1187_v63  ;;  %v1510_v11 = vpop.f32.mrb[37].mxu0  ;;  %2559 = vrot.lane.b32.xlu1 %v3217_v14, %s3720_s8  ;;  %v3335_v32 = vpop.f32.mrb[101].mxu1 }
 0x1bb   : > { %v3185_v24 = vpack.c.bf16 %v2253_v36, %v2253_v36  ;;  %v3336_v54 = vadd.f32 %v3335_v32, %v3334_v15  ;;  %v1511_v47 = vpop.f32.mrb[38].mxu0  ;;  %v3337_v61 = vpop.f32.mrb[102].mxu1  ;;  %2413 = vst.msk [vmem:[%s4713_s30 + $0x40] sm:$0xf] %vm2396_vm0, %v3184_v33 }
 0x1bc   : > { %v1581_v29 = vmax.f32 %v3413_v31, 0.0  ;;  %v3415_v7 = vadd.f32 %v1511_v47, %v1190_v16  ;;  %v1513_v18 = vpop.f32.mrb[39].mxu0  ;;  %v3338_v59 = vpop.f32.mrb[103].mxu1  ;;  %v5207_v47 = vld [vmem:[#allocation8_spill] sm:$0xff] }
 0x1bd   : > { %v2182_v19 = vadd.f32 %v3336_v54, %v5199_v41  ;;  %v3339_v42 = vadd.f32 %v3338_v59, %v3337_v61  ;;  %2414 = vst.msk [vmem:[%s4713_s30 + $0x44] sm:$0xf] %vm2396_vm0, %v3185_v24  ;;  %v4862_v22 = vpop.permute.xlu1 %2772  ;;  %v4864_v53 = vpop.permute.xlu0 %2774  ;;  %v5206_v24 = vld [vmem:[#allocation34_spill] sm:$0xff]  ;;  %v5208_v61 = vld [vmem:[#allocation29_spill] sm:$0xff] }
 0x1be   : > { %v3218_v45 = vpack.c.bf16 %v1581_v29, %v1581_v29  ;;  %v1582_v50 = vmax.f32 %v3415_v7, 0.0  ;;  %v1203_v29 = vadd.f32 %v5208_v61, %v5207_v47 }
 0x1bf   : > { %v2254_v26 = vmax.f32 %v2182_v19, 0.0  ;;  %v2185_v46 = vadd.f32 %v3339_v42, %v5200_v0 }
 0x1c0   : > { %v3219_v58 = vpack.c.bf16 %v1582_v50, %v1582_v50  ;;  %2561 = vrot.lane.b32.xlu0 %v3218_v45, %s3720_s8  ;;  %v5209_v50 = vld [vmem:[#allocation9_spill] sm:$0xff] }
 0x1c1   : > { %v3186_v52 = vpack.c.bf16 %v2254_v26, %v2254_v26  ;;  %v2255_v43 = vmax.f32 %v2185_v46, 0.0  ;;  %v1516_v4 = vpop.f32.mrb[40].mxu0  ;;  %v3340_v40 = vpop.f32.mrb[104].mxu1  ;;  %v5210_v26 = vld [vmem:[#allocation30_spill] sm:$0xff] }
 0x1c2   : > { %v3417_v38 = vadd.f32 %v1516_v4, %v1195_v25  ;;  %v1518_v9 = vpop.f32.mrb[41].mxu0  ;;  %2563 = vrot.lane.b32.xlu1 %v3219_v58, %s3720_s8  ;;  %v3341_v10 = vpop.f32.mrb[105].mxu1  ;;  %v1206_v0 = vadd.f32 %v5210_v26, %v5209_v50 }
 0x1c3   : > { %v3187_v27 = vpack.c.bf16 %v2255_v43, %v2255_v43  ;;  %v3342_v28 = vadd.f32 %v3341_v10, %v3340_v40  ;;  %v1519_v63 = vpop.f32.mrb[42].mxu0  ;;  %v3343_v14 = vpop.f32.mrb[106].mxu1  ;;  %2415 = vst.msk [vmem:[%s4713_s30 + $0x48] sm:$0xf] %vm2396_vm0, %v3186_v52 }
 0x1c4   : > { %v1583_v33 = vmax.f32 %v3417_v38, 0.0  ;;  %v3419_v36 = vadd.f32 %v1519_v63, %v1198_v21  ;;  %v1521_v20 = vpop.f32.mrb[43].mxu0  ;;  %v3344_v15 = vpop.f32.mrb[107].mxu1  ;;  %v5211_v21 = vld [vmem:[#allocation36_spill] sm:$0xff]  ;;  %v5212_v63 = vld [vmem:[#allocation37_spill] sm:$0xff] }
 0x1c5   : > { %v2190_v49 = vadd.f32 %v3342_v28, %v5205_v56  ;;  %v3345_v16 = vadd.f32 %v3344_v15, %v3343_v14  ;;  %2416 = vst.msk [vmem:[%s4713_s30 + $0x4c] sm:$0xf] %vm2396_vm0, %v3187_v27  ;;  %v4878_v18 = vpop.permute.xlu1 %2776  ;;  %v4880_v59 = vpop.permute.xlu0 %2778 }
 0x1c6   : > { %v3220_v31 = vpack.c.bf16 %v1583_v33, %v1583_v33  ;;  %v1584_v11 = vmax.f32 %v3419_v36, 0.0  ;;  %v5213_v33 = vld [vmem:[#allocation10_spill] sm:$0xff]  ;;  %v5214_v36 = vld [vmem:[#allocation33_spill] sm:$0xff] }
 0x1c7   : > { %v2256_v32 = vmax.f32 %v2190_v49, 0.0  ;;  %v2193_v54 = vadd.f32 %v3345_v16, %v5206_v24  ;;  %v1211_v20 = vadd.f32 %v5214_v36, %v5213_v33  ;;  %v5215_v24 = vld [vmem:[#allocation11_spill] sm:$0xff]  ;;  %v5221_v33 = vld [vmem:[#allocation13_spill] sm:$0xff]  ;;  %v5222_v36 = vld [vmem:[#allocation40_spill] sm:$0xff] }
 0x1c8   : > { %v3221_v7 = vpack.c.bf16 %v1584_v11, %v1584_v11  ;;  %2565 = vrot.lane.b32.xlu0 %v3220_v31, %s3720_s8 }
 0x1c9   : > { %v3188_v41 = vpack.c.bf16 %v2256_v32, %v2256_v32  ;;  %v2257_v19 = vmax.f32 %v2193_v54, 0.0  ;;  %v1524_v42 = vpop.f32.mrb[44].mxu0  ;;  %v3346_v45 = vpop.f32.mrb[108].mxu1  ;;  %v5216_v54 = vld [vmem:[#allocation35_spill] sm:$0xff] }
 0x1ca   : > { %v3421_v46 = vadd.f32 %v1524_v42, %v1203_v29  ;;  %v1526_v8 = vpop.f32.mrb[45].mxu0  ;;  %2567 = vrot.lane.b32.xlu1 %v3221_v7, %s3720_s8  ;;  %v3347_v17 = vpop.f32.mrb[109].mxu1  ;;  %v1214_v47 = vadd.f32 %v5216_v54, %v5215_v24 }
 0x1cb   : > { %v3189_v25 = vpack.c.bf16 %v2257_v19, %v2257_v19  ;;  %v3348_v58 = vadd.f32 %v3347_v17, %v3346_v45  ;;  %v1527_v52 = vpop.f32.mrb[46].mxu0  ;;  %v3349_v43 = vpop.f32.mrb[110].mxu1  ;;  %2417 = vst.msk [vmem:[%s4713_s30 + $0x50] sm:$0xf] %vm2396_vm0, %v3188_v41  ;;  %v5217_v8 = vld [vmem:[#allocation39_spill] sm:$0xff] }
 0x1cc   : > { %v1585_v4 = vmax.f32 %v3421_v46, 0.0  ;;  %v3423_v40 = vadd.f32 %v1527_v52, %v1206_v0  ;;  %v1529_v57 = vpop.f32.mrb[47].mxu0  ;;  %v3350_v48 = vpop.f32.mrb[111].mxu1 }
 0x1cd   : > { %v2198_v38 = vadd.f32 %v3348_v58, %v5211_v21  ;;  %v3351_v9 = vadd.f32 %v3350_v48, %v3349_v43  ;;  %2418 = vst.msk [vmem:[%s4713_s30 + $0x54] sm:$0xf] %vm2396_vm0, %v3189_v25  ;;  %v4894_v56 = vpop.permute.xlu1 %2780  ;;  %v4896_v49 = vpop.permute.xlu0 %2782  ;;  %v5219_v57 = vld [vmem:[#allocation12_spill] sm:$0xff]  ;;  %v5220_v48 = vld [vmem:[#allocation38_spill] sm:$0xff] }
 0x1ce   : > { %v3222_v10 = vpack.c.bf16 %v1585_v4, %v1585_v4  ;;  %v1586_v27 = vmax.f32 %v3423_v40, 0.0  ;;  %v5218_v4 = vld [vmem:[#allocation41_spill] sm:$0xff]  ;;  %v1219_v21 = vadd.f32 %v5220_v48, %v5219_v57 }
 0x1cf   : > { %v2258_v28 = vmax.f32 %v2198_v38, 0.0  ;;  %v2201_v14 = vadd.f32 %v3351_v9, %v5212_v63 }
 0x1d0   : > { %v3223_v15 = vpack.c.bf16 %v1586_v27, %v1586_v27  ;;  %2569 = vrot.lane.b32.xlu0 %v3222_v10, %s3720_s8 }
 0x1d1   : > { %v3190_v16 = vpack.c.bf16 %v2258_v28, %v2258_v28  ;;  %v2259_v31 = vmax.f32 %v2201_v14, 0.0  ;;  %v1532_v11 = vpop.f32.mrb[48].mxu0  ;;  %v3352_v32 = vpop.f32.mrb[112].mxu1 }
 0x1d2   : > { %v3425_v61 = vadd.f32 %v1532_v11, %v1211_v20  ;;  %v1534_v29 = vpop.f32.mrb[49].mxu0  ;;  %2571 = vrot.lane.b32.xlu1 %v3223_v15, %s3720_s8  ;;  %v3353_v7 = vpop.f32.mrb[113].mxu1  ;;  %v1222_v20 = vadd.f32 %v5222_v36, %v5221_v33 }
 0x1d3   : > { %v3191_v41 = vpack.c.bf16 %v2259_v31, %v2259_v31  ;;  %v3354_v19 = vadd.f32 %v3353_v7, %v3352_v32  ;;  %v1535_v42 = vpop.f32.mrb[50].mxu0  ;;  %v3355_v45 = vpop.f32.mrb[114].mxu1  ;;  %2419 = vst.msk [vmem:[%s4713_s30 + $0x58] sm:$0xf] %vm2396_vm0, %v3190_v16 }
 0x1d4   : > { %v1587_v50 = vmax.f32 %v3425_v61, 0.0  ;;  %v3427_v26 = vadd.f32 %v1535_v42, %v1214_v47  ;;  %v1537_v0 = vpop.f32.mrb[51].mxu0  ;;  %v3356_v46 = vpop.f32.mrb[115].mxu1 }
 0x1d5   : > { %v2206_v17 = vadd.f32 %v3354_v19, %v5217_v8  ;;  %v3357_v25 = vadd.f32 %v3356_v46, %v3355_v45  ;;  %2420 = vst.msk [vmem:[%s4713_s30 + $0x5c] sm:$0xf] %vm2396_vm0, %v3191_v41  ;;  %v4910_v9 = vpop.permute.xlu1 %2784  ;;  %v4912_v10 = vpop.permute.xlu0 %2786  ;;  %v5223_v41 = vld [vmem:[#allocation42_spill] sm:$0xff]  ;;  %v5224_v0 = vld [vmem:[#allocation45_spill] sm:$0xff] }
 0x1d6   : > { %v3224_v58 = vpack.c.bf16 %v1587_v50, %v1587_v50  ;;  %v1588_v52 = vmax.f32 %v3427_v26, 0.0  ;;  %v5225_v8 = vld [vmem:[#allocation14_spill] sm:$0xff] }
 0x1d7   : > { %v2260_v43 = vmax.f32 %v2206_v17, 0.0  ;;  %v2209_v40 = vadd.f32 %v3357_v25, %v5218_v4  ;;  %v5226_v17 = vld [vmem:[#allocation43_spill] sm:$0xff] }
 0x1d8   : > { %v3225_v38 = vpack.c.bf16 %v1588_v52, %v1588_v52  ;;  %2573 = vrot.lane.b32.xlu0 %v3224_v58, %s3720_s8  ;;  %v1227_v25 = vadd.f32 %v5226_v17, %v5225_v8 }
 0x1d9   : > { %v3192_v27 = vpack.c.bf16 %v2260_v43, %v2260_v43  ;;  %v2261_v28 = vmax.f32 %v2209_v40, 0.0  ;;  %v1540_v63 = vpop.f32.mrb[52].mxu0  ;;  %v3358_v14 = vpop.f32.mrb[116].mxu1 }
 0x1da   : > { %v3429_v15 = vadd.f32 %v1540_v63, %v1219_v21  ;;  %v1542_v16 = vpop.f32.mrb[53].mxu0  ;;  %2575 = vrot.lane.b32.xlu1 %v3225_v38, %s3720_s8  ;;  %v3359_v31 = vpop.f32.mrb[117].mxu1  ;;  %v5227_v21 = vld [vmem:[#allocation15_spill] sm:$0xff]  ;;  %v5228_v38 = vld [vmem:[#allocation44_spill] sm:$0xff] }
 0x1db   : > { %v3193_v11 = vpack.c.bf16 %v2261_v28, %v2261_v28  ;;  %v3360_v32 = vadd.f32 %v3359_v31, %v3358_v14  ;;  %v1543_v24 = vpop.f32.mrb[54].mxu0  ;;  %v3361_v54 = vpop.f32.mrb[118].mxu1  ;;  %2421 = vst.msk [vmem:[%s4713_s30 + $0x60] sm:$0xf] %vm2396_vm0, %v3192_v27  ;;  %v1230_v27 = vadd.f32 %v5228_v38, %v5227_v21 }
 0x1dc   : > { %v1589_v47 = vmax.f32 %v3429_v15, 0.0  ;;  %v3431_v61 = vadd.f32 %v1543_v24, %v1222_v20  ;;  %v1545_v29 = vpop.f32.mrb[55].mxu0  ;;  %v3362_v7 = vpop.f32.mrb[119].mxu1  ;;  %v5229_v24 = vld [vmem:[#allocation46_spill] sm:$0xff] }
 0x1dd   : > { %v2214_v19 = vadd.f32 %v3360_v32, %v5223_v41  ;;  %v3363_v42 = vadd.f32 %v3362_v7, %v3361_v54  ;;  %2422 = vst.msk [vmem:[%s4713_s30 + $0x64] sm:$0xf] %vm2396_vm0, %v3193_v11  ;;  %v4926_v52 = vpop.permute.xlu1 %2788  ;;  %v4928_v43 = vpop.permute.xlu0 %2790  ;;  %v5230_v41 = vld [vmem:[#allocation48_spill] sm:$0xff] }
 0x1de   : > { %v3226_v45 = vpack.c.bf16 %v1589_v47, %v1589_v47  ;;  %v1590_v50 = vmax.f32 %v3431_v61, 0.0 }
 0x1df   : > { %v2262_v26 = vmax.f32 %v2214_v19, 0.0  ;;  %v2217_v46 = vadd.f32 %v3363_v42, %v5224_v0 }
 0x1e0   : > { %v3227_v58 = vpack.c.bf16 %v1590_v50, %v1590_v50  ;;  %2577 = vrot.lane.b32.xlu0 %v3226_v45, %s3720_s8  ;;  %v5231_v45 = vld [vmem:[#allocation16_spill] sm:$0xff]  ;;  %v5232_v50 = vld [vmem:[#allocation47_spill] sm:$0xff] }
 0x1e1   : > { %v3194_v4 = vpack.c.bf16 %v2262_v26, %v2262_v26  ;;  %v2263_v40 = vmax.f32 %v2217_v46, 0.0  ;;  %v1548_v57 = vpop.f32.mrb[56].mxu0  ;;  %v3364_v48 = vpop.f32.mrb[120].mxu1  ;;  %v1235_v26 = vadd.f32 %v5232_v50, %v5231_v45 }
 0x1e2   : > { %v3433_v28 = vadd.f32 %v1548_v57, %v1227_v25  ;;  %v1550_v63 = vpop.f32.mrb[57].mxu0  ;;  %2579 = vrot.lane.b32.xlu1 %v3227_v58, %s3720_s8  ;;  %v3365_v14 = vpop.f32.mrb[121].mxu1  ;;  %v5233_v58 = vld [vmem:[#allocation17_spill] sm:$0xff] }
 0x1e3   : > { %v3195_v33 = vpack.c.bf16 %v2263_v40, %v2263_v40  ;;  %v3366_v36 = vadd.f32 %v3365_v14, %v3364_v48  ;;  %v1551_v20 = vpop.f32.mrb[58].mxu0  ;;  %v3367_v15 = vpop.f32.mrb[122].mxu1  ;;  %2423 = vst.msk [vmem:[%s4713_s30 + $0x68] sm:$0xf] %vm2396_vm0, %v3194_v4  ;;  %v5234_v4 = vld [vmem:[#allocation49_spill] sm:$0xff]  ;;  %v5235_v14 = vld [vmem:[#allocation52_spill] sm:$0xff] }
 0x1e4   : > { %v1591_v16 = vmax.f32 %v3433_v28, 0.0  ;;  %v3435_v31 = vadd.f32 %v1551_v20, %v1230_v27  ;;  %v1553_v11 = vpop.f32.mrb[59].mxu0  ;;  %v3368_v32 = vpop.f32.mrb[123].mxu1  ;;  %v1238_v40 = vadd.f32 %v5234_v4, %v5233_v58 }
 0x1e5   : > { %v2222_v54 = vadd.f32 %v3366_v36, %v5229_v24  ;;  %v3369_v47 = vadd.f32 %v3368_v32, %v3367_v15  ;;  %2424 = vst.msk [vmem:[%s4713_s30 + $0x6c] sm:$0xf] %vm2396_vm0, %v3195_v33  ;;  %v4939_v42 = vpop.permute.xlu1 %2792  ;;  %v1625_v11 = vld [vmem:[%s5134_s6 + $0xf0] sm:$0xff]  ;;  %v5236_v24 = vld [vmem:[#allocation50_spill] sm:$0xff] }
 0x1e6   : > { %v3228_v61 = vpack.c.bf16 %v1591_v16, %v1591_v16  ;;  %v1592_v29 = vmax.f32 %v3435_v31, 0.0  ;;  %v3262_v50 = vpack.c.bf16 %v1625_v11, %v1625_v11 }
 0x1e7   : > { %v2264_v7 = vmax.f32 %v2222_v54, 0.0  ;;  %v2225_v19 = vadd.f32 %v3369_v47, %v5230_v41 }
 0x1e8   : > { %v3229_v0 = vpack.c.bf16 %v1592_v29, %v1592_v29  ;;  %2581 = vrot.lane.b32.xlu0 %v3228_v61, %s3720_s8  ;;  %v1626_v29 = vld [vmem:[%s5134_s6 + $0xf8] sm:$0xff] }
 0x1e9   : > { %v3196_v46 = vpack.c.bf16 %v2264_v7, %v2264_v7  ;;  %v2265_v8 = vmax.f32 %v2225_v19, 0.0  ;;  %v1556_v17 = vpop.f32.mrb[60].mxu0  ;;  %v3370_v25 = vpop.f32.mrb[124].mxu1  ;;  %v5237_v19 = vld [vmem:[#allocation51_spill] sm:$0xff] }
 0x1ea   : > { %v3437_v57 = vadd.f32 %v1556_v17, %v1235_v26  ;;  %v1558_v48 = vpop.f32.mrb[61].mxu0  ;;  %2583 = vrot.lane.b32.xlu1 %v3229_v0, %s3720_s8  ;;  %v2526_v21 = vpop.permute.xlu0 %2525 }
 0x1eb   : > { %v3197_v38 = vpack.c.bf16 %v2265_v8, %v2265_v8  ;;  %2622 = vst.msk [vmem:[%s4713_s30] sm:$0xf] %vm2621_vm1, %v2526_v21  ;;  %v3371_v27 = vpop.f32.mrb[125].mxu1  ;;  %v1559_v28 = vpop.f32.mrb[62].mxu0 }
 0x1ec   : > { %2425 = vst.msk [vmem:[%s4713_s30 + $0x70] sm:$0xf] %vm2396_vm0, %v3196_v46  ;;  %v1593_v63 = vmax.f32 %v3437_v57, 0.0  ;;  %v3372_v33 = vadd.f32 %v3371_v27, %v3370_v25  ;;  %v3439_v36 = vadd.f32 %v1559_v28, %v1238_v40  ;;  %v3373_v20 = vpop.f32.mrb[126].mxu1  ;;  %v1561_v15 = vpop.f32.mrb[63].mxu0  ;;  %v3263_v46 = vpack.c.bf16 %v1626_v29, %v1626_v29 }
 0x1ed   : > { %2831 = vst.msk [vmem:[%s4713_s30] sm:$0xf] %vm2830_vm2, %v5235_v14  ;;  %v2528_v16 = vpop.permute.xlu1 %2527  ;;  %v3374_v31 = vpop.f32.mrb[127].mxu1 }
 0x1ee   : > { %2426 = vst.msk [vmem:[%s4713_s30 + $0x74] sm:$0xf] %vm2396_vm0, %v3197_v38  ;;  %v3230_v32 = vpack.c.bf16 %v1593_v63, %v1593_v63  ;;  %v2230_v54 = vadd.f32 %v3372_v33, %v5236_v24  ;;  %v1594_v47 = vmax.f32 %v3439_v36, 0.0  ;;  %v3375_v61 = vadd.f32 %v3374_v31, %v3373_v20 }
 0x1ef   : > { %2623 = vst.msk [vmem:[%s4713_s30 + $0x4] sm:$0xf] %vm2621_vm1, %v2528_v16 }
 0x1f0   : > { %2832 = vst.msk [vmem:[%s4713_s30 + $0x4] sm:$0xf] %vm2830_vm2, %v4718_v12  ;;  %v2266_v7 = vmax.f32 %v2230_v54, 0.0  ;;  %v3231_v41 = vpack.c.bf16 %v1594_v47, %v1594_v47  ;;  %v2233_v45 = vadd.f32 %v3375_v61, %v5237_v19  ;;  %2585 = vrot.lane.b32.xlu0 %v3230_v32, %s3720_s8 }
 0x1f2   : > { %v3198_v26 = vpack.c.bf16 %v2266_v7, %v2266_v7  ;;  %v2267_v0 = vmax.f32 %v2233_v45, 0.0  ;;  %2587 = vrot.lane.b32.xlu1 %v3231_v41, %s3720_s8  ;;  %v2530_v12 = vpop.permute.xlu0 %2529 }
 0x1f3   : > { %2624 = vst.msk [vmem:[%s4713_s30 + $0x8] sm:$0xf] %vm2621_vm1, %v2530_v12 }
 0x1f4   : > { %2427 = vst.msk [vmem:[%s4713_s30 + $0x78] sm:$0xf] %vm2396_vm0, %v3198_v26  ;;  %v3199_v8 = vpack.c.bf16 %v2267_v0, %v2267_v0  ;;  %v2532_v17 = vpop.permute.xlu1 %2531  ;;  %2794 = vrot.lane.b32.xlu0 %v3262_v50, %s3719_s12 }
 0x1f5   : > { %2833 = vst.msk [vmem:[%s4713_s30 + $0x8] sm:$0xf] %vm2830_vm2, %v4720_v51 }
 0x1f6   : > { %2625 = vst.msk [vmem:[%s4713_s30 + $0xc] sm:$0xf] %vm2621_vm1, %v2532_v17  ;;  %2796 = vrot.lane.b32.xlu1 %v3263_v46, %s3719_s12 }
 0x1f7   : > { %2428 = vst.msk [vmem:[%s4713_s30 + $0x7c] sm:$0xf] %vm2396_vm0, %v3199_v8 }
 0x1f8   : > { %2834 = vst.msk [vmem:[%s4713_s30 + $0xc] sm:$0xf] %vm2830_vm2, %v4734_v35 }
 0x1fa   : > { %v2534_v25 = vpop.permute.xlu0 %2533 }
 0x1fb   : > { %2626 = vst.msk [vmem:[%s4713_s30 + $0x10] sm:$0xf] %vm2621_vm1, %v2534_v25 }
 0x1fc   : > { %2835 = vst.msk [vmem:[%s4713_s30 + $0x10] sm:$0xf] %vm2830_vm2, %v4736_v60  ;;  %v2536_v51 = vpop.permute.xlu1 %2535 }
 0x1fd   : > { %2627 = vst.msk [vmem:[%s4713_s30 + $0x14] sm:$0xf] %vm2621_vm1, %v2536_v51 }
 0x1fe   : > { %2836 = vst.msk [vmem:[%s4713_s30 + $0x14] sm:$0xf] %vm2830_vm2, %v4750_v44 }
 0x202   : > { %v2538_v35 = vpop.permute.xlu0 %2537 }
 0x203   : > { %2628 = vst.msk [vmem:[%s4713_s30 + $0x18] sm:$0xf] %vm2621_vm1, %v2538_v35 }
 0x204   : > { %2837 = vst.msk [vmem:[%s4713_s30 + $0x18] sm:$0xf] %vm2830_vm2, %v4752_v30  ;;  %v2540_v58 = vpop.permute.xlu1 %2539 }
 0x205   : > { %2629 = vst.msk [vmem:[%s4713_s30 + $0x1c] sm:$0xf] %vm2621_vm1, %v2540_v58 }
 0x206   : > { %2838 = vst.msk [vmem:[%s4713_s30 + $0x1c] sm:$0xf] %vm2830_vm2, %v4766_v3 }
 0x20a   : > { %v2542_v60 = vpop.permute.xlu0 %2541 }
 0x20b   : > { %2630 = vst.msk [vmem:[%s4713_s30 + $0x20] sm:$0xf] %vm2621_vm1, %v2542_v60 }
 0x20c   : > { %2839 = vst.msk [vmem:[%s4713_s30 + $0x20] sm:$0xf] %vm2830_vm2, %v4768_v55  ;;  %v2544_v44 = vpop.permute.xlu1 %2543 }
 0x20d   : > { %2631 = vst.msk [vmem:[%s4713_s30 + $0x24] sm:$0xf] %vm2621_vm1, %v2544_v44 }
 0x20e   : > { %2840 = vst.msk [vmem:[%s4713_s30 + $0x24] sm:$0xf] %vm2830_vm2, %v4782_v13 }
 0x212   : > { %v2546_v30 = vpop.permute.xlu0 %2545 }
 0x213   : > { %2632 = vst.msk [vmem:[%s4713_s30 + $0x28] sm:$0xf] %vm2621_vm1, %v2546_v30 }
 0x214   : > { %2841 = vst.msk [vmem:[%s4713_s30 + $0x28] sm:$0xf] %vm2830_vm2, %v4784_v23  ;;  %v2548_v3 = vpop.permute.xlu1 %2547 }
 0x215   : > { %2633 = vst.msk [vmem:[%s4713_s30 + $0x2c] sm:$0xf] %vm2621_vm1, %v2548_v3 }
 0x216   : > { %2842 = vst.msk [vmem:[%s4713_s30 + $0x2c] sm:$0xf] %vm2830_vm2, %v4798_v37 }
 0x21a   : > { %v2550_v55 = vpop.permute.xlu0 %2549 }
 0x21b   : > { %2634 = vst.msk [vmem:[%s4713_s30 + $0x30] sm:$0xf] %vm2621_vm1, %v2550_v55 }
 0x21c   : > { %2843 = vst.msk [vmem:[%s4713_s30 + $0x30] sm:$0xf] %vm2830_vm2, %v4800_v1  ;;  %v2552_v13 = vpop.permute.xlu1 %2551 }
 0x21d   : > { %2635 = vst.msk [vmem:[%s4713_s30 + $0x34] sm:$0xf] %vm2621_vm1, %v2552_v13 }
 0x21e   : > { %2844 = vst.msk [vmem:[%s4713_s30 + $0x34] sm:$0xf] %vm2830_vm2, %v4814_v39 }
 0x222   : > { %v2554_v23 = vpop.permute.xlu0 %2553 }
 0x223   : > { %2636 = vst.msk [vmem:[%s4713_s30 + $0x38] sm:$0xf] %vm2621_vm1, %v2554_v23 }
 0x224   : > { %2845 = vst.msk [vmem:[%s4713_s30 + $0x38] sm:$0xf] %vm2830_vm2, %v4816_v34  ;;  %v2556_v37 = vpop.permute.xlu1 %2555 }
 0x225   : > { %2637 = vst.msk [vmem:[%s4713_s30 + $0x3c] sm:$0xf] %vm2621_vm1, %v2556_v37 }
 0x226   : > { %2846 = vst.msk [vmem:[%s4713_s30 + $0x3c] sm:$0xf] %vm2830_vm2, %v4830_v6 }
 0x22a   : > { %v2558_v1 = vpop.permute.xlu0 %2557 }
 0x22b   : > { %2638 = vst.msk [vmem:[%s4713_s30 + $0x40] sm:$0xf] %vm2621_vm1, %v2558_v1 }
 0x22c   : > { %2847 = vst.msk [vmem:[%s4713_s30 + $0x40] sm:$0xf] %vm2830_vm2, %v4832_v5  ;;  %v2560_v39 = vpop.permute.xlu1 %2559 }
 0x22d   : > { %2639 = vst.msk [vmem:[%s4713_s30 + $0x44] sm:$0xf] %vm2621_vm1, %v2560_v39 }
 0x22e   : > { %2848 = vst.msk [vmem:[%s4713_s30 + $0x44] sm:$0xf] %vm2830_vm2, %v4846_v62 }
 0x232   : > { %v2562_v34 = vpop.permute.xlu0 %2561 }
 0x233   : > { %2640 = vst.msk [vmem:[%s4713_s30 + $0x48] sm:$0xf] %vm2621_vm1, %v2562_v34 }
 0x234   : > { %2849 = vst.msk [vmem:[%s4713_s30 + $0x48] sm:$0xf] %vm2830_vm2, %v4848_v2  ;;  %v2564_v6 = vpop.permute.xlu1 %2563 }
 0x235   : > { %2641 = vst.msk [vmem:[%s4713_s30 + $0x4c] sm:$0xf] %vm2621_vm1, %v2564_v6 }
 0x236   : > { %2850 = vst.msk [vmem:[%s4713_s30 + $0x4c] sm:$0xf] %vm2830_vm2, %v4862_v22 }
 0x23a   : > { %v2566_v5 = vpop.permute.xlu0 %2565 }
 0x23b   : > { %2642 = vst.msk [vmem:[%s4713_s30 + $0x50] sm:$0xf] %vm2621_vm1, %v2566_v5 }
 0x23c   : > { %2851 = vst.msk [vmem:[%s4713_s30 + $0x50] sm:$0xf] %vm2830_vm2, %v4864_v53  ;;  %v2568_v62 = vpop.permute.xlu1 %2567 }
 0x23d   : > { %2643 = vst.msk [vmem:[%s4713_s30 + $0x54] sm:$0xf] %vm2621_vm1, %v2568_v62 }
 0x23e   : > { %2852 = vst.msk [vmem:[%s4713_s30 + $0x54] sm:$0xf] %vm2830_vm2, %v4878_v18 }
 0x242   : > { %v2570_v2 = vpop.permute.xlu0 %2569 }
 0x243   : > { %2644 = vst.msk [vmem:[%s4713_s30 + $0x58] sm:$0xf] %vm2621_vm1, %v2570_v2 }
 0x244   : > { %2853 = vst.msk [vmem:[%s4713_s30 + $0x58] sm:$0xf] %vm2830_vm2, %v4880_v59  ;;  %v2572_v22 = vpop.permute.xlu1 %2571 }
 0x245   : > { %2645 = vst.msk [vmem:[%s4713_s30 + $0x5c] sm:$0xf] %vm2621_vm1, %v2572_v22 }
 0x246   : > { %2854 = vst.msk [vmem:[%s4713_s30 + $0x5c] sm:$0xf] %vm2830_vm2, %v4894_v56 }
 0x24a   : > { %v2574_v53 = vpop.permute.xlu0 %2573 }
 0x24b   : > { %2646 = vst.msk [vmem:[%s4713_s30 + $0x60] sm:$0xf] %vm2621_vm1, %v2574_v53 }
 0x24c   : > { %2855 = vst.msk [vmem:[%s4713_s30 + $0x60] sm:$0xf] %vm2830_vm2, %v4896_v49  ;;  %v2576_v18 = vpop.permute.xlu1 %2575 }
 0x24d   : > { %2647 = vst.msk [vmem:[%s4713_s30 + $0x64] sm:$0xf] %vm2621_vm1, %v2576_v18 }
 0x24e   : > { %2856 = vst.msk [vmem:[%s4713_s30 + $0x64] sm:$0xf] %vm2830_vm2, %v4910_v9 }
 0x252   : > { %v2578_v59 = vpop.permute.xlu0 %2577 }
 0x253   : > { %2648 = vst.msk [vmem:[%s4713_s30 + $0x68] sm:$0xf] %vm2621_vm1, %v2578_v59 }
 0x254   : > { %2857 = vst.msk [vmem:[%s4713_s30 + $0x68] sm:$0xf] %vm2830_vm2, %v4912_v10  ;;  %v2580_v56 = vpop.permute.xlu1 %2579 }
 0x255   : > { %2649 = vst.msk [vmem:[%s4713_s30 + $0x6c] sm:$0xf] %vm2621_vm1, %v2580_v56 }
 0x256   : > { %2858 = vst.msk [vmem:[%s4713_s30 + $0x6c] sm:$0xf] %vm2830_vm2, %v4926_v52 }
 0x25a   : > { %v2582_v49 = vpop.permute.xlu0 %2581 }
 0x25b   : > { %2650 = vst.msk [vmem:[%s4713_s30 + $0x70] sm:$0xf] %vm2621_vm1, %v2582_v49 }
 0x25c   : > { %2859 = vst.msk [vmem:[%s4713_s30 + $0x70] sm:$0xf] %vm2830_vm2, %v4928_v43  ;;  %v2584_v9 = vpop.permute.xlu1 %2583 }
 0x25d   : > { %2651 = vst.msk [vmem:[%s4713_s30 + $0x74] sm:$0xf] %vm2621_vm1, %v2584_v9 }
 0x25e   : > { %2860 = vst.msk [vmem:[%s4713_s30 + $0x74] sm:$0xf] %vm2830_vm2, %v4939_v42 }
 0x262   : > { %v2586_v10 = vpop.permute.xlu0 %2585 }
 0x263   : > { %2652 = vst.msk [vmem:[%s4713_s30 + $0x78] sm:$0xf] %vm2621_vm1, %v2586_v10 }
 0x264   : > { %v2588_v4 = vpop.permute.xlu1 %2587 }
 0x265   : > { %2653 = vst.msk [vmem:[%s4713_s30 + $0x7c] sm:$0xf] %vm2621_vm1, %v2588_v4 }
 0x266   : > { %v2795_v40 = vpop.permute.xlu0 %2794 }
 0x267   : > { %2861 = vst.msk [vmem:[%s4713_s30 + $0x78] sm:$0xf] %vm2830_vm2, %v2795_v40 }
 0x268   : > { %v2797_v52 = vpop.permute.xlu1 %2796 }
 0x269   : > { %2862 = vst.msk [vmem:[%s4713_s30 + $0x7c] sm:$0xf] %vm2830_vm2, %v2797_v52 }
 0x26a PF: > { %s17_s24 = sadd.s32 1, %s3716_s24  }
 0x26b   : > { %p14_p4 = scmp.ge.s32.totalorder %s17_s24, 4  }
 0x26d   :  { %16 = sbr.rel (!%p14_p4) target bundleno = 1 (0x1), region = 81 }

</bundles_post_ra>
